<compile_context>
chip_gen: v7x
topology: tpu7x:2x2x1
jax: 0.10.0
libtpu: 0.0.40
codegen_flags: <defaults>
</compile_context>

<pallas_src>
import functools

import jax
import jax.numpy as jnp
from jax.experimental import pallas as pl
from jax.experimental.pallas import tpu as pltpu

BN_EPS = 0.8          # nn.BatchNorm1d(out_feat, 0.8) -> eps = 0.8
LRELU_SLOPE = 0.2
LANES = 128


def _round_up(n, m):
    return ((n + m - 1) // m) * m


def generator_kernel(
    z_ref,
    w1_ref, b1_ref,
    w2_ref, b2_ref, g2_ref, be2_ref,
    w3_ref, b3_ref, g3_ref, be3_ref,
    w4_hbm, b4_ref, g4_ref, be4_ref,
    w5_hbm, b5_ref,
    out_ref,
    w4_vmem, w5_vmem, dma_sems,
):
    # Prefetch the two dominant weight DMAs (w4: 512x1024, w5: 1024xN_p,
    # ~1.5-2.5 MB bf16 together) so their HBM->VMEM transfer overlaps with
    # the layers 1-3 matmuls instead of serializing before the kernel body.
    cp_w4 = pltpu.make_async_copy(w4_hbm, w4_vmem, dma_sems.at[0])
    cp_w5 = pltpu.make_async_copy(w5_hbm, w5_vmem, dma_sems.at[1])
    cp_w4.start()
    cp_w5.start()

    def linear(x_bf16, w_bf16, b_ref):
        # bf16 operands on the MXU, f32 accumulator, f32 bias add.
        y = jnp.dot(x_bf16, w_bf16, preferred_element_type=jnp.float32)
        return y + b_ref[...]

    def batchnorm(x, gamma_ref, beta_ref):
        # Training-mode BatchNorm1d: batch mean, biased batch variance.
        # Single pass: var = E[x^2] - E[x]^2 (eps=0.8 keeps rsqrt well away
        # from cancellation), then fold gamma*inv and (beta - mean*gamma*inv)
        # into one scale/shift -> 2 VPU ops per element.
        # NOTE: the two sublane reductions could be fused (concat [x, x*x]
        # along lanes or a ones-row MXU matmul); at these widths the XLU is
        # far from the bottleneck so the extra copy is not worth it.
        mean = jnp.mean(x, axis=0, keepdims=True)
        mean_sq = jnp.mean(x * x, axis=0, keepdims=True)
        var = mean_sq - mean * mean
        inv = jax.lax.rsqrt(var + BN_EPS)
        scale = gamma_ref[...] * inv
        shift = beta_ref[...] - mean * scale
        return x * scale + shift

    def act(x_f32):
        # LeakyReLU(0.2); produce the next layer's bf16 MXU operand directly
        # so h lives in bf16 between layers (one pack per layer, half the
        # inter-layer VMEM/vreg footprint).
        return jnp.where(x_f32 > 0, x_f32, LRELU_SLOPE * x_f32).astype(jnp.bfloat16)

    x = z_ref[...].astype(jnp.bfloat16)

    # block(latent, 128, normalize=False)
    h = act(linear(x, w1_ref[...], b1_ref))
    # block(128, 256)
    h = act(batchnorm(linear(h, w2_ref[...], b2_ref), g2_ref, be2_ref))
    # block(256, 512)
    h = act(batchnorm(linear(h, w3_ref[...], b3_ref), g3_ref, be3_ref))
    # block(512, 1024)  -- w4 arrives via the prefetched DMA
    cp_w4.wait()
    h = act(batchnorm(linear(h, w4_vmem[...], b4_ref), g4_ref, be4_ref))
    # Linear(1024, prod(img_shape)) -> Tanh
    cp_w5.wait()
    y = linear(h, w5_vmem[...], b5_ref)
    out_ref[...] = jnp.tanh(y).astype(out_ref.dtype)


def init_params(key, latent_dim, img_shape):
    """Deterministic parameter init (PyTorch-style uniform bounds).

    Weights are stored (in, out) in bf16; biases / BN affine stay f32.
    The first layer's fan-in and the last layer's fan-out are zero-padded to
    128-lane multiples; padded z columns are zero and padded output columns
    are dropped (or never created when prod(img_shape) % 128 == 0), so the
    padding never affects the result.
    """
    out_dim = 1
    for d in img_shape:
        out_dim *= d
    latent_p = _round_up(latent_dim, LANES)
    out_dim_p = _round_up(out_dim, LANES)

    real_dims = [latent_dim, 128, 256, 512, 1024, out_dim]
    pad_dims = [latent_p, 128, 256, 512, 1024, out_dim_p]

    params = {}
    keys = jax.random.split(key, 2 * 5)
    for i in range(5):
        fan_in, fan_out = real_dims[i], real_dims[i + 1]
        bound = 1.0 / (fan_in ** 0.5)
        w = jax.random.uniform(keys[2 * i], (fan_in, fan_out),
                               jnp.float32, -bound, bound)
        b = jax.random.uniform(keys[2 * i + 1], (1, fan_out),
                               jnp.float32, -bound, bound)
        # Zero-pad to lane-friendly shapes (no garbage MXU/EUP work).
        w = jnp.pad(w, ((0, pad_dims[i] - fan_in),
                        (0, pad_dims[i + 1] - fan_out)))
        b = jnp.pad(b, ((0, 0), (0, pad_dims[i + 1] - fan_out)))
        params[f"w{i+1}"] = w.astype(jnp.bfloat16)   # MXU operand
        params[f"b{i+1}"] = b                        # f32 bias add
    # BatchNorm affine params (layers 2, 3, 4): gamma=1, beta=0
    for i, width in zip((2, 3, 4), (256, 512, 1024)):
        params[f"g{i}"] = jnp.ones((1, width), jnp.float32)
        params[f"be{i}"] = jnp.zeros((1, width), jnp.float32)
    return params


@functools.partial(jax.jit, static_argnames=("img_shape", "out_dtype"))
def generator_forward(z, params, img_shape, out_dtype=jnp.bfloat16):
    batch, latent_dim = z.shape
    latent_p = _round_up(latent_dim, LANES)
    out_dim = 1
    for d in img_shape:
        out_dim *= d
    out_dim_p = _round_up(out_dim, LANES)

    # Lane-pad z with zeros so layer 1 is lane-dense (tiny copy, (B, 128)).
    if latent_p != latent_dim:
        z = jnp.pad(z, ((0, 0), (0, latent_p - latent_dim)))

    operands = (
        z,
        params["w1"], params["b1"],
        params["w2"], params["b2"], params["g2"], params["be2"],
        params["w3"], params["b3"], params["g3"], params["be3"],
        params["w4"], params["b4"], params["g4"], params["be4"],
        params["w5"], params["b5"],
    )
    vmem = pl.BlockSpec(memory_space=pltpu.MemorySpace.VMEM)
    hbm = pl.BlockSpec(memory_space=pl.ANY)   # manual DMA inside the kernel
    in_specs = [
        vmem,                    # z
        vmem, vmem,              # w1, b1
        vmem, vmem, vmem, vmem,  # w2, b2, g2, be2
        vmem, vmem, vmem, vmem,  # w3, b3, g3, be3
        hbm,  vmem, vmem, vmem,  # w4 (prefetched), b4, g4, be4
        hbm,  vmem,              # w5 (prefetched), b5
    ]

    flat = pl.pallas_call(
        generator_kernel,
        out_shape=jax.ShapeDtypeStruct((batch, out_dim_p), out_dtype),
        in_specs=in_specs,
        out_specs=vmem,
        scratch_shapes=[
            pltpu.VMEM((512, 1024), jnp.bfloat16),        # w4 landing buffer
            pltpu.VMEM((1024, out_dim_p), jnp.bfloat16),  # w5 landing buffer
            pltpu.SemaphoreType.DMA((2,)),
        ],
        # Working set is a few MiB; 32 MiB is above v5e's 16 MiB scoped
        # default and leaves headroom everywhere (v7x physical VMEM = 64 MiB).
        compiler_params=pltpu.CompilerParams(vmem_limit_bytes=32 * 1024 * 1024),
    )(*operands)

    # Only slice when the output width actually needed padding; when
    # prod(img_shape) % 128 == 0 this is a pure view (no HBM round trip).
    if out_dim_p != out_dim:
        flat = flat[:, :out_dim]
    return flat.reshape((batch,) + tuple(img_shape))


if __name__ == "__main__":
    latent_dim = 32
    img_shape = (1, 16, 16)     # (C, H, W); prod = 256 -> no post-kernel slice
    batch = 8                   # smoke-test size only; use B >= 256 (v6e/v7x)
                                # or >= 128 (v5e), multiples of 128, for real
                                # throughput (this is the primary perf knob)

    key = jax.random.PRNGKey(0)
    k_params, k_z = jax.random.split(key)
    params = init_params(k_params, latent_dim, img_shape)
    z = jax.random.normal(k_z, (batch, latent_dim), jnp.float32)

    img = generator_forward(z, params, img_shape)
    jax.block_until_ready(img)

    assert img.shape == (batch,) + img_shape, img.shape
    assert img.dtype == jnp.bfloat16, img.dtype
    img_f32 = img.astype(jnp.float32)
    assert bool(jnp.all(jnp.isfinite(img_f32)))
    assert bool(jnp.all(jnp.abs(img_f32) <= 1.0))   # tanh output range
    print("KERNEL_OK")
</pallas_src>

<mosaic_0001>
module attributes {stable_mosaic.version = 11 : i64} {
  func.func @generator_kernel(%arg0: memref<8x128xf32, #tpu.memory_space<vmem>>, %arg1: memref<128x128xbf16, #tpu.memory_space<vmem>>, %arg2: memref<1x128xf32, #tpu.memory_space<vmem>>, %arg3: memref<128x256xbf16, #tpu.memory_space<vmem>>, %arg4: memref<1x256xf32, #tpu.memory_space<vmem>>, %arg5: memref<1x256xf32, #tpu.memory_space<vmem>>, %arg6: memref<1x256xf32, #tpu.memory_space<vmem>>, %arg7: memref<256x512xbf16, #tpu.memory_space<vmem>>, %arg8: memref<1x512xf32, #tpu.memory_space<vmem>>, %arg9: memref<1x512xf32, #tpu.memory_space<vmem>>, %arg10: memref<1x512xf32, #tpu.memory_space<vmem>>, %arg11: memref<512x1024xbf16, #tpu.memory_space<any>>, %arg12: memref<1x1024xf32, #tpu.memory_space<vmem>>, %arg13: memref<1x1024xf32, #tpu.memory_space<vmem>>, %arg14: memref<1x1024xf32, #tpu.memory_space<vmem>>, %arg15: memref<1024x256xbf16, #tpu.memory_space<any>>, %arg16: memref<1x256xf32, #tpu.memory_space<vmem>>, %arg17: memref<8x256xbf16, #tpu.memory_space<vmem>>, %arg18: memref<512x1024xbf16, #tpu.memory_space<vmem>>, %arg19: memref<1024x256xbf16, #tpu.memory_space<vmem>>, %arg20: memref<2x!tpu.dma_semaphore, #tpu.memory_space<semaphore_mem>>) attributes {dimension_semantics = [], scalar_prefetch = 0 : i64, scratch_operands = 3 : i64, tpu.core_type = #tpu.core_type<tc>} {
    %c0_i32 = arith.constant 0 : i32
    %0 = tpu.memref_slice %arg20[%c0_i32] : memref<2x!tpu.dma_semaphore, #tpu.memory_space<semaphore_mem>> -> memref<1x!tpu.dma_semaphore, #tpu.memory_space<semaphore_mem>>
    %1 = tpu.memref_squeeze %0 : memref<1x!tpu.dma_semaphore, #tpu.memory_space<semaphore_mem>> -> memref<!tpu.dma_semaphore, #tpu.memory_space<semaphore_mem>>
    tpu.enqueue_dma source(%arg11 : memref<512x1024xbf16, #tpu.memory_space<any>>) target(%arg18 : memref<512x1024xbf16, #tpu.memory_space<vmem>>) target_semaphore(%1 : memref<!tpu.dma_semaphore, #tpu.memory_space<semaphore_mem>>)
    %c1_i32 = arith.constant 1 : i32
    %2 = tpu.memref_slice %arg20[%c1_i32] : memref<2x!tpu.dma_semaphore, #tpu.memory_space<semaphore_mem>> -> memref<1x!tpu.dma_semaphore, #tpu.memory_space<semaphore_mem>>
    %3 = tpu.memref_squeeze %2 : memref<1x!tpu.dma_semaphore, #tpu.memory_space<semaphore_mem>> -> memref<!tpu.dma_semaphore, #tpu.memory_space<semaphore_mem>>
    tpu.enqueue_dma source(%arg15 : memref<1024x256xbf16, #tpu.memory_space<any>>) target(%arg19 : memref<1024x256xbf16, #tpu.memory_space<vmem>>) target_semaphore(%3 : memref<!tpu.dma_semaphore, #tpu.memory_space<semaphore_mem>>)
    %c0 = arith.constant 0 : index
    %c0_0 = arith.constant 0 : index
    %4 = vector.load %arg0[%c0, %c0_0] : memref<8x128xf32, #tpu.memory_space<vmem>>, vector<8x128xf32>
    %5 = arith.truncf %4 : vector<8x128xf32> to vector<8x128xbf16>
    %c0_1 = arith.constant 0 : index
    %c0_2 = arith.constant 0 : index
    %6 = vector.load %arg1[%c0_1, %c0_2] : memref<128x128xbf16, #tpu.memory_space<vmem>>, vector<128x128xbf16>
    %cst = arith.constant dense<0.000000e+00> : vector<8x128xf32>
    %7 = tpu.matmul %5, %6, %cst {dimension_numbers = #tpu.dot_dimension_numbers<[1], [0], [0], [1], [0, 0, 1, 1], [], []>} : vector<8x128xbf16>, vector<128x128xbf16>, vector<8x128xf32> -> vector<8x128xf32>
    %c0_3 = arith.constant 0 : index
    %c0_4 = arith.constant 0 : index
    %8 = vector.load %arg2[%c0_3, %c0_4] : memref<1x128xf32, #tpu.memory_space<vmem>>, vector<1x128xf32>
    %9 = vector.broadcast %8 : vector<1x128xf32> to vector<8x128xf32>
    %10 = arith.addf %7, %9 : vector<8x128xf32>
    %cst_5 = arith.constant 0.000000e+00 : f32
    %11 = vector.broadcast %cst_5 : f32 to vector<8x128xf32>
    %12 = arith.cmpf ogt, %10, %11 : vector<8x128xf32>
    %cst_6 = arith.constant 2.000000e-01 : f32
    %13 = vector.broadcast %cst_6 : f32 to vector<8x128xf32>
    %14 = arith.mulf %13, %10 : vector<8x128xf32>
    %15 = arith.select %12, %10, %14 : vector<8x128xi1>, vector<8x128xf32>
    %16 = arith.truncf %15 : vector<8x128xf32> to vector<8x128xbf16>
    %c0_7 = arith.constant 0 : index
    %c0_8 = arith.constant 0 : index
    %17 = vector.load %arg3[%c0_7, %c0_8] : memref<128x256xbf16, #tpu.memory_space<vmem>>, vector<128x256xbf16>
    %cst_9 = arith.constant dense<0.000000e+00> : vector<8x256xf32>
    %18 = tpu.matmul %16, %17, %cst_9 {dimension_numbers = #tpu.dot_dimension_numbers<[1], [0], [0], [1], [0, 0, 1, 1], [], []>} : vector<8x128xbf16>, vector<128x256xbf16>, vector<8x256xf32> -> vector<8x256xf32>
    %c0_10 = arith.constant 0 : index
    %c0_11 = arith.constant 0 : index
    %19 = vector.load %arg4[%c0_10, %c0_11] : memref<1x256xf32, #tpu.memory_space<vmem>>, vector<1x256xf32>
    %20 = vector.broadcast %19 : vector<1x256xf32> to vector<8x256xf32>
    %21 = arith.addf %18, %20 : vector<8x256xf32>
    %cst_12 = arith.constant dense<0.000000e+00> : vector<256xf32>
    %22 = vector.multi_reduction <add>, %21, %cst_12 [0] : vector<8x256xf32> to vector<256xf32>
    %23 = vector.shape_cast %22 : vector<256xf32> to vector<1x256xf32>
    %cst_13 = arith.constant 8.000000e+00 : f32
    %24 = vector.broadcast %cst_13 : f32 to vector<1x256xf32>
    %25 = arith.divf %23, %24 : vector<1x256xf32>
    %26 = arith.mulf %21, %21 : vector<8x256xf32>
    %cst_14 = arith.constant dense<0.000000e+00> : vector<256xf32>
    %27 = vector.multi_reduction <add>, %26, %cst_14 [0] : vector<8x256xf32> to vector<256xf32>
    %28 = vector.shape_cast %27 : vector<256xf32> to vector<1x256xf32>
    %cst_15 = arith.constant 8.000000e+00 : f32
    %29 = vector.broadcast %cst_15 : f32 to vector<1x256xf32>
    %30 = arith.divf %28, %29 : vector<1x256xf32>
    %31 = arith.mulf %25, %25 : vector<1x256xf32>
    %32 = arith.subf %30, %31 : vector<1x256xf32>
    %cst_16 = arith.constant 8.000000e-01 : f32
    %33 = vector.broadcast %cst_16 : f32 to vector<1x256xf32>
    %34 = arith.addf %32, %33 : vector<1x256xf32>
    %35 = math.rsqrt %34 : vector<1x256xf32>
    %c0_17 = arith.constant 0 : index
    %c0_18 = arith.constant 0 : index
    %36 = vector.load %arg5[%c0_17, %c0_18] : memref<1x256xf32, #tpu.memory_space<vmem>>, vector<1x256xf32>
    %37 = arith.mulf %36, %35 : vector<1x256xf32>
    %c0_19 = arith.constant 0 : index
    %c0_20 = arith.constant 0 : index
    %38 = vector.load %arg6[%c0_19, %c0_20] : memref<1x256xf32, #tpu.memory_space<vmem>>, vector<1x256xf32>
    %39 = arith.mulf %25, %37 : vector<1x256xf32>
    %40 = arith.subf %38, %39 : vector<1x256xf32>
    %41 = vector.broadcast %37 : vector<1x256xf32> to vector<8x256xf32>
    %42 = arith.mulf %21, %41 : vector<8x256xf32>
    %43 = vector.broadcast %40 : vector<1x256xf32> to vector<8x256xf32>
    %44 = arith.addf %42, %43 : vector<8x256xf32>
    %cst_21 = arith.constant 0.000000e+00 : f32
    %45 = vector.broadcast %cst_21 : f32 to vector<8x256xf32>
    %46 = arith.cmpf ogt, %44, %45 : vector<8x256xf32>
    %cst_22 = arith.constant 2.000000e-01 : f32
    %47 = vector.broadcast %cst_22 : f32 to vector<8x256xf32>
    %48 = arith.mulf %47, %44 : vector<8x256xf32>
    %49 = arith.select %46, %44, %48 : vector<8x256xi1>, vector<8x256xf32>
    %50 = arith.truncf %49 : vector<8x256xf32> to vector<8x256xbf16>
    %c0_23 = arith.constant 0 : index
    %c0_24 = arith.constant 0 : index
    %51 = vector.load %arg7[%c0_23, %c0_24] : memref<256x512xbf16, #tpu.memory_space<vmem>>, vector<256x512xbf16>
    %cst_25 = arith.constant dense<0.000000e+00> : vector<8x512xf32>
    %52 = tpu.matmul %50, %51, %cst_25 {dimension_numbers = #tpu.dot_dimension_numbers<[1], [0], [0], [1], [0, 0, 1, 1], [], []>} : vector<8x256xbf16>, vector<256x512xbf16>, vector<8x512xf32> -> vector<8x512xf32>
    %c0_26 = arith.constant 0 : index
    %c0_27 = arith.constant 0 : index
    %53 = vector.load %arg8[%c0_26, %c0_27] : memref<1x512xf32, #tpu.memory_space<vmem>>, vector<1x512xf32>
    %54 = vector.broadcast %53 : vector<1x512xf32> to vector<8x512xf32>
    %55 = arith.addf %52, %54 : vector<8x512xf32>
    %cst_28 = arith.constant dense<0.000000e+00> : vector<512xf32>
    %56 = vector.multi_reduction <add>, %55, %cst_28 [0] : vector<8x512xf32> to vector<512xf32>
    %57 = vector.shape_cast %56 : vector<512xf32> to vector<1x512xf32>
    %cst_29 = arith.constant 8.000000e+00 : f32
    %58 = vector.broadcast %cst_29 : f32 to vector<1x512xf32>
    %59 = arith.divf %57, %58 : vector<1x512xf32>
    %60 = arith.mulf %55, %55 : vector<8x512xf32>
    %cst_30 = arith.constant dense<0.000000e+00> : vector<512xf32>
    %61 = vector.multi_reduction <add>, %60, %cst_30 [0] : vector<8x512xf32> to vector<512xf32>
    %62 = vector.shape_cast %61 : vector<512xf32> to vector<1x512xf32>
    %cst_31 = arith.constant 8.000000e+00 : f32
    %63 = vector.broadcast %cst_31 : f32 to vector<1x512xf32>
    %64 = arith.divf %62, %63 : vector<1x512xf32>
    %65 = arith.mulf %59, %59 : vector<1x512xf32>
    %66 = arith.subf %64, %65 : vector<1x512xf32>
    %cst_32 = arith.constant 8.000000e-01 : f32
    %67 = vector.broadcast %cst_32 : f32 to vector<1x512xf32>
    %68 = arith.addf %66, %67 : vector<1x512xf32>
    %69 = math.rsqrt %68 : vector<1x512xf32>
    %c0_33 = arith.constant 0 : index
    %c0_34 = arith.constant 0 : index
    %70 = vector.load %arg9[%c0_33, %c0_34] : memref<1x512xf32, #tpu.memory_space<vmem>>, vector<1x512xf32>
    %71 = arith.mulf %70, %69 : vector<1x512xf32>
    %c0_35 = arith.constant 0 : index
    %c0_36 = arith.constant 0 : index
    %72 = vector.load %arg10[%c0_35, %c0_36] : memref<1x512xf32, #tpu.memory_space<vmem>>, vector<1x512xf32>
    %73 = arith.mulf %59, %71 : vector<1x512xf32>
    %74 = arith.subf %72, %73 : vector<1x512xf32>
    %75 = vector.broadcast %71 : vector<1x512xf32> to vector<8x512xf32>
    %76 = arith.mulf %55, %75 : vector<8x512xf32>
    %77 = vector.broadcast %74 : vector<1x512xf32> to vector<8x512xf32>
    %78 = arith.addf %76, %77 : vector<8x512xf32>
    %cst_37 = arith.constant 0.000000e+00 : f32
    %79 = vector.broadcast %cst_37 : f32 to vector<8x512xf32>
    %80 = arith.cmpf ogt, %78, %79 : vector<8x512xf32>
    %cst_38 = arith.constant 2.000000e-01 : f32
    %81 = vector.broadcast %cst_38 : f32 to vector<8x512xf32>
    %82 = arith.mulf %81, %78 : vector<8x512xf32>
    %83 = arith.select %80, %78, %82 : vector<8x512xi1>, vector<8x512xf32>
    %84 = arith.truncf %83 : vector<8x512xf32> to vector<8x512xbf16>
    %c0_i32_39 = arith.constant 0 : i32
    %85 = tpu.memref_slice %arg20[%c0_i32_39] : memref<2x!tpu.dma_semaphore, #tpu.memory_space<semaphore_mem>> -> memref<1x!tpu.dma_semaphore, #tpu.memory_space<semaphore_mem>>
    %86 = tpu.memref_squeeze %85 : memref<1x!tpu.dma_semaphore, #tpu.memory_space<semaphore_mem>> -> memref<!tpu.dma_semaphore, #tpu.memory_space<semaphore_mem>>
    tpu.wait_dma2 semaphore(%86 : memref<!tpu.dma_semaphore, #tpu.memory_space<semaphore_mem>>) src(%arg11 : memref<512x1024xbf16, #tpu.memory_space<any>>) dst(%arg18 : memref<512x1024xbf16, #tpu.memory_space<vmem>>)
    %c0_40 = arith.constant 0 : index
    %c0_41 = arith.constant 0 : index
    %87 = vector.load %arg18[%c0_40, %c0_41] : memref<512x1024xbf16, #tpu.memory_space<vmem>>, vector<512x1024xbf16>
    %cst_42 = arith.constant dense<0.000000e+00> : vector<8x1024xf32>
    %88 = tpu.matmul %84, %87, %cst_42 {dimension_numbers = #tpu.dot_dimension_numbers<[1], [0], [0], [1], [0, 0, 1, 1], [], []>} : vector<8x512xbf16>, vector<512x1024xbf16>, vector<8x1024xf32> -> vector<8x1024xf32>
    %c0_43 = arith.constant 0 : index
    %c0_44 = arith.constant 0 : index
    %89 = vector.load %arg12[%c0_43, %c0_44] : memref<1x1024xf32, #tpu.memory_space<vmem>>, vector<1x1024xf32>
    %90 = vector.broadcast %89 : vector<1x1024xf32> to vector<8x1024xf32>
    %91 = arith.addf %88, %90 : vector<8x1024xf32>
    %cst_45 = arith.constant dense<0.000000e+00> : vector<1024xf32>
    %92 = vector.multi_reduction <add>, %91, %cst_45 [0] : vector<8x1024xf32> to vector<1024xf32>
    %93 = vector.shape_cast %92 : vector<1024xf32> to vector<1x1024xf32>
    %cst_46 = arith.constant 8.000000e+00 : f32
    %94 = vector.broadcast %cst_46 : f32 to vector<1x1024xf32>
    %95 = arith.divf %93, %94 : vector<1x1024xf32>
    %96 = arith.mulf %91, %91 : vector<8x1024xf32>
    %cst_47 = arith.constant dense<0.000000e+00> : vector<1024xf32>
    %97 = vector.multi_reduction <add>, %96, %cst_47 [0] : vector<8x1024xf32> to vector<1024xf32>
    %98 = vector.shape_cast %97 : vector<1024xf32> to vector<1x1024xf32>
    %cst_48 = arith.constant 8.000000e+00 : f32
    %99 = vector.broadcast %cst_48 : f32 to vector<1x1024xf32>
    %100 = arith.divf %98, %99 : vector<1x1024xf32>
    %101 = arith.mulf %95, %95 : vector<1x1024xf32>
    %102 = arith.subf %100, %101 : vector<1x1024xf32>
    %cst_49 = arith.constant 8.000000e-01 : f32
    %103 = vector.broadcast %cst_49 : f32 to vector<1x1024xf32>
    %104 = arith.addf %102, %103 : vector<1x1024xf32>
    %105 = math.rsqrt %104 : vector<1x1024xf32>
    %c0_50 = arith.constant 0 : index
    %c0_51 = arith.constant 0 : index
    %106 = vector.load %arg13[%c0_50, %c0_51] : memref<1x1024xf32, #tpu.memory_space<vmem>>, vector<1x1024xf32>
    %107 = arith.mulf %106, %105 : vector<1x1024xf32>
    %c0_52 = arith.constant 0 : index
    %c0_53 = arith.constant 0 : index
    %108 = vector.load %arg14[%c0_52, %c0_53] : memref<1x1024xf32, #tpu.memory_space<vmem>>, vector<1x1024xf32>
    %109 = arith.mulf %95, %107 : vector<1x1024xf32>
    %110 = arith.subf %108, %109 : vector<1x1024xf32>
    %111 = vector.broadcast %107 : vector<1x1024xf32> to vector<8x1024xf32>
    %112 = arith.mulf %91, %111 : vector<8x1024xf32>
    %113 = vector.broadcast %110 : vector<1x1024xf32> to vector<8x1024xf32>
    %114 = arith.addf %112, %113 : vector<8x1024xf32>
    %cst_54 = arith.constant 0.000000e+00 : f32
    %115 = vector.broadcast %cst_54 : f32 to vector<8x1024xf32>
    %116 = arith.cmpf ogt, %114, %115 : vector<8x1024xf32>
    %cst_55 = arith.constant 2.000000e-01 : f32
    %117 = vector.broadcast %cst_55 : f32 to vector<8x1024xf32>
    %118 = arith.mulf %117, %114 : vector<8x1024xf32>
    %119 = arith.select %116, %114, %118 : vector<8x1024xi1>, vector<8x1024xf32>
    %120 = arith.truncf %119 : vector<8x1024xf32> to vector<8x1024xbf16>
    %c1_i32_56 = arith.constant 1 : i32
    %121 = tpu.memref_slice %arg20[%c1_i32_56] : memref<2x!tpu.dma_semaphore, #tpu.memory_space<semaphore_mem>> -> memref<1x!tpu.dma_semaphore, #tpu.memory_space<semaphore_mem>>
    %122 = tpu.memref_squeeze %121 : memref<1x!tpu.dma_semaphore, #tpu.memory_space<semaphore_mem>> -> memref<!tpu.dma_semaphore, #tpu.memory_space<semaphore_mem>>
    tpu.wait_dma2 semaphore(%122 : memref<!tpu.dma_semaphore, #tpu.memory_space<semaphore_mem>>) src(%arg15 : memref<1024x256xbf16, #tpu.memory_space<any>>) dst(%arg19 : memref<1024x256xbf16, #tpu.memory_space<vmem>>)
    %c0_57 = arith.constant 0 : index
    %c0_58 = arith.constant 0 : index
    %123 = vector.load %arg19[%c0_57, %c0_58] : memref<1024x256xbf16, #tpu.memory_space<vmem>>, vector<1024x256xbf16>
    %cst_59 = arith.constant dense<0.000000e+00> : vector<8x256xf32>
    %124 = tpu.matmul %120, %123, %cst_59 {dimension_numbers = #tpu.dot_dimension_numbers<[1], [0], [0], [1], [0, 0, 1, 1], [], []>} : vector<8x1024xbf16>, vector<1024x256xbf16>, vector<8x256xf32> -> vector<8x256xf32>
    %c0_60 = arith.constant 0 : index
    %c0_61 = arith.constant 0 : index
    %125 = vector.load %arg16[%c0_60, %c0_61] : memref<1x256xf32, #tpu.memory_space<vmem>>, vector<1x256xf32>
    %126 = vector.broadcast %125 : vector<1x256xf32> to vector<8x256xf32>
    %127 = arith.addf %124, %126 : vector<8x256xf32>
    %128 = math.tanh %127 : vector<8x256xf32>
    %129 = arith.truncf %128 : vector<8x256xf32> to vector<8x256xbf16>
    %c0_62 = arith.constant 0 : index
    %c0_63 = arith.constant 0 : index
    %130 = vector.load %arg17[%c0_62, %c0_63] : memref<8x256xbf16, #tpu.memory_space<vmem>>, vector<8x256xbf16>
    tpu.vector_store %arg17[%c0_62, %c0_63], %129 {strides = array<i32>} : memref<8x256xbf16, #tpu.memory_space<vmem>>, vector<8x256xbf16>,
    return
  }
}

</mosaic_0001>

<bundles_post_ra>
// kernel: generator_forward.1
= control target key start
LH: loop header
LB: loop body
LE: loop exit
PB: predicated region body
PF: predicated region fallthrough
CT: control target
= control target key end

     0   :  { %s3752_s0 = inlined_call_operand.vmem [shape: f32[8,128], index: 0, kind: input, shape index: {}]   ;;  %s3753_s1 = inlined_call_operand.hbm [shape: bf16[128,128], index: 1, kind: input, shape index: {}]   ;;  %s3754_s2 = inlined_call_operand.hbm [shape: f32[1,128], index: 2, kind: input, shape index: {}]   ;;  %s3755_s3 = inlined_call_operand.hbm [shape: bf16[128,256], index: 3, kind: input, shape index: {}]   ;;  %s3756_s4 = inlined_call_operand.hbm [shape: f32[1,256], index: 4, kind: input, shape index: {}]   ;;  %s3757_s5 = inlined_call_operand.vmem [shape: f32[1,256], index: 5, kind: input, shape index: {}]   ;;  %s3758_s6 = inlined_call_operand.hbm [shape: f32[1,256], index: 6, kind: input, shape index: {}]   ;;  %s3759_s7 = inlined_call_operand.hbm [shape: bf16[256,512], index: 7, kind: input, shape index: {}]   ;;  %s3760_s8 = inlined_call_operand.vmem [shape: f32[1,512], index: 8, kind: input, shape index: {}]   ;;  %s3761_s9 = inlined_call_operand.vmem [shape: f32[1,512], index: 9, kind: input, shape index: {}]   ;;  %s3762_s10 = inlined_call_operand.vmem [shape: f32[1,512], index: 10, kind: input, shape index: {}]   ;;  %s3763_s11 = inlined_call_operand.hbm [shape: bf16[512,1024], index: 11, kind: input, shape index: {}]   ;;  %s3764_s12 = inlined_call_operand.vmem [shape: f32[1,1024], index: 12, kind: input, shape index: {}]   ;;  %s3765_s13 = inlined_call_operand.vmem [shape: f32[1,1024], index: 13, kind: input, shape index: {}]   ;;  %s3766_s14 = inlined_call_operand.vmem [shape: f32[1,1024], index: 14, kind: input, shape index: {}]   ;;  %s3767_s15 = inlined_call_operand.hbm [shape: bf16[1024,256], index: 15, kind: input, shape index: {}]   ;;  %s3768_s16 = inlined_call_operand.hbm [shape: f32[1,256], index: 16, kind: input, shape index: {}]   ;;  %s3769_s17 = inlined_call_operand.vmem [shape: bf16[8,256], index: 17, kind: output, shape index: {}]  }
   0x1   :  { %3773 = sst [smem:[#allocation26_spill]] %s3752_s0 }
   0x2   :  { %3774 = sst [smem:[#allocation27_spill]] %s3753_s1 }
   0x3   :  { %22 = vsyncpa [#allocation6], 0 }
   0x4   :  { %23 = vsyncpa [#allocation8], 0 }
   0x5   :  { %24 = vsyncpa [#allocation11], 0 }
   0x6   :  { %25 = vsyncpa [#allocation14], 0  ;;  %s3181_s24 = smov [#allocation7]   ;;  %s3182_s26 = smov [#allocation10]  }
   0x7   :  { %s46_s25 = sshll.u32 %s3181_s24, 4  ;;  %s68_s27 = sshll.u32 %s3182_s26, 4  ;;  %s47_s25 = int_to_ptr.vmem [resolvable:$true] %s46_s25  ;;  %s69_s27 = int_to_ptr.vmem [resolvable:$true] %s68_s27 }
   0x8   :  { %s3015_s0 = scalar_lea.hbm %s3754_s2, 16 }
   0x9   :  { %p3016_p0 = scmp.ne.s32.totalorder %s3754_s2, %s3015_s0  ;;  %p3019_p1 = scmp.lt.u32.totalorder %s3015_s0, %s3754_s2 }
   0xb   :  { %p3021_p2 = pnand %p3019_p1, %p3016_p0 }
   0xd   :  { %3024 = shalt.err (!%p3021_p2)
}
   0xe   :  { %s3025_s20 = scalar_lea.vmem %s47_s25, 16  ;;  %s3029_s21 = scalar_lea.vmem %s47_s25, 32 }
   0xf   :  { %p3026_p3 = scmp.ne.s32.totalorder %s47_s25, %s3025_s20  ;;  %p3030_p4 = scmp.lt.s32.totalorder %s47_s25, %s47_s25 }
  0x10   :  { %p3031_p5 = scmp.lt.s32.totalorder %s3029_s21, %s3025_s20 }
  0x12   :  { %p3032_p6 = por %p3031_p5, %p3030_p4 }
  0x14   :  { %p3033_p7 = pnand %p3032_p6, %p3026_p3 }
  0x16   :  { %3036 = shalt.err (!%p3033_p7)
}
  0x17   :  { %49 = dma.hbm_to_vmem [thread:$0]  %s3754_s2, 16, %s47_s25, [#allocation8]  }
  0x18   :  { %s3037_s28 = scalar_lea.hbm %s3756_s4, 32 }
  0x19   :  { %p3038_p8 = scmp.ne.s32.totalorder %s3756_s4, %s3037_s28  ;;  %p3041_p9 = scmp.lt.u32.totalorder %s3037_s28, %s3756_s4 }
  0x1b   :  { %p3043_p10 = pnand %p3041_p9, %p3038_p8 }
  0x1d   :  { %3046 = shalt.err (!%p3043_p10)
}
  0x1e   :  { %s3047_s19 = scalar_lea.vmem %s69_s27, 32  ;;  %p3052_p12 = scmp.lt.s32.totalorder %s69_s27, %s69_s27 }
  0x1f   :  { %p3048_p11 = scmp.ne.s32.totalorder %s69_s27, %s3047_s19  ;;  %p3053_p13 = scmp.lt.s32.totalorder %s3047_s19, %s3047_s19 }
  0x21   :  { %p3054_p0 = por %p3053_p13, %p3052_p12 }
  0x23   :  { %p3055_p1 = pnand %p3054_p0, %p3048_p11 }
  0x25   :  { %3058 = shalt.err (!%p3055_p1)
}
  0x26   :  { %71 = dma.hbm_to_vmem [thread:$0]  %s3756_s4, 32, %s69_s27, [#allocation11]  }
  0x27   :  { %s3183_s1 = smov [#allocation13]   ;;  %s3059_s23 = scalar_lea.hbm %s3759_s7, 8192 }
  0x28   :  { %s89_s20 = sshll.u32 %s3183_s1, 4  ;;  %p3060_p2 = scmp.ne.s32.totalorder %s3759_s7, %s3059_s23  ;;  %s90_s20 = int_to_ptr.vmem [resolvable:$true] %s89_s20 }
  0x29   :  { %p3063_p3 = scmp.lt.u32.totalorder %s3059_s23, %s3759_s7 }
  0x2b   :  { %p3065_p4 = pnand %p3063_p3, %p3060_p2 }
  0x2d   :  { %3068 = shalt.err (!%p3065_p4)
}
  0x2e   :  { %s3069_s0 = scalar_lea.vmem %s90_s20, 8192  ;;  %p3074_p6 = scmp.lt.s32.totalorder %s90_s20, %s90_s20 }
  0x2f   :  { %p3070_p5 = scmp.ne.s32.totalorder %s90_s20, %s3069_s0  ;;  %p3075_p7 = scmp.lt.s32.totalorder %s3069_s0, %s3069_s0 }
  0x31   :  { %p3076_p8 = por %p3075_p7, %p3074_p6 }
  0x33   :  { %p3077_p9 = pnand %p3076_p8, %p3070_p5 }
  0x35   :  { %3080 = shalt.err (!%p3077_p9)
}
  0x36   :  { %s3771_s4 = smov 256   ;;  %s3185_s27 = smov 16  }
  0x37   :  { %95 = dma.hbm_to_vmem [thread:$0]  %s3759_s7, 8192, %s90_s20, [#allocation14], %s3771_s4, %s3771_s4, %s3185_s27  }
  0x38   :  { %s3186_s19 = smov [#allocation5]   ;;  %s3775_s21 = sld [smem:[#allocation27_spill]] }
  0x39   :  { %s33_s2 = sshll.u32 %s3186_s19, 4  ;;  %s34_s2 = int_to_ptr.vmem [resolvable:$true] %s33_s2 }
  0x3e   :  { %s3081_s22 = scalar_lea.hbm %s3775_s21, 1024 }
  0x3f   :  { %p3082_p10 = scmp.ne.s32.totalorder %s3775_s21, %s3081_s22  ;;  %p3085_p11 = scmp.lt.u32.totalorder %s3081_s22, %s3775_s21 }
  0x41   :  { %p3087_p12 = pnand %p3085_p11, %p3082_p10 }
  0x43   :  { %3090 = shalt.err (!%p3087_p12)
}
  0x44   :  { %s3091_s29 = scalar_lea.vmem %s34_s2, 1024  ;;  %p3096_p0 = scmp.lt.s32.totalorder %s34_s2, %s34_s2 }
  0x45   :  { %p3092_p13 = scmp.ne.s32.totalorder %s34_s2, %s3091_s29  ;;  %p3097_p1 = scmp.lt.s32.totalorder %s3091_s29, %s3091_s29 }
  0x47   :  { %p3098_p2 = por %p3097_p1, %p3096_p0 }
  0x49   :  { %p3099_p3 = pnand %p3098_p2, %p3092_p13 }
  0x4b   :  { %3102 = shalt.err (!%p3099_p3)
}
  0x4c   :  { %s3187_s7 = smov 64   ;;  %s3188_s20 = smov 4  }
  0x4d   :  { %39 = dma.hbm_to_vmem [thread:$0]  %s3775_s21, 1024, %s34_s2, [#allocation6], %s3187_s7, %s3187_s7, %s3188_s20  }
  0x4e   :  { %s3189_s30 = smov [#allocation9]   ;;  %s3103_s1 = scalar_lea.hbm %s3755_s3, 2048 }
  0x4f   :  { %s55_s18 = sshll.u32 %s3189_s30, 4  ;;  %p3104_p4 = scmp.ne.s32.totalorder %s3755_s3, %s3103_s1  ;;  %s56_s18 = int_to_ptr.vmem [resolvable:$true] %s55_s18 }
  0x50   :  { %p3107_p5 = scmp.lt.u32.totalorder %s3103_s1, %s3755_s3 }
  0x52   :  { %p3109_p6 = pnand %p3107_p5, %p3104_p4 }
  0x54   :  { %3112 = shalt.err (!%p3109_p6)
}
  0x55   :  { %s3113_s28 = scalar_lea.vmem %s56_s18, 2048  ;;  %p3118_p8 = scmp.lt.s32.totalorder %s56_s18, %s56_s18 }
  0x56   :  { %p3114_p7 = scmp.ne.s32.totalorder %s56_s18, %s3113_s28  ;;  %p3119_p9 = scmp.lt.s32.totalorder %s3113_s28, %s3113_s28 }
  0x58   :  { %p3120_p10 = por %p3119_p9, %p3118_p8 }
  0x5a   :  { %p3121_p11 = pnand %p3120_p10, %p3114_p7 }
  0x5c   :  { %3124 = shalt.err (!%p3121_p11)
}
  0x5d   :  { %s3190_s2 = smov 128   ;;  %s3191_s21 = smov 8  }
  0x5e   :  { %61 = dma.hbm_to_vmem [thread:$0]  %s3755_s3, 2048, %s56_s18, [#allocation8], %s3190_s2, %s3190_s2, %s3191_s21  }
  0x5f   :  { %s3192_s27 = smov [#allocation12]   ;;  %s3193_s19 = smov [#allocation15]  }
  0x60   :  { %s80_s30 = sshll.u32 %s3192_s27, 4  ;;  %s114_s25 = sshll.u32 %s3193_s19, 4  ;;  %s81_s30 = int_to_ptr.vmem [resolvable:$true] %s80_s30  ;;  %s115_s25 = int_to_ptr.vmem [resolvable:$true] %s114_s25 }
  0x61   :  { %s3125_s23 = scalar_lea.hbm %s3758_s6, 32 }
  0x62   :  { %p3126_p12 = scmp.ne.s32.totalorder %s3758_s6, %s3125_s23  ;;  %p3129_p13 = scmp.lt.u32.totalorder %s3125_s23, %s3758_s6 }
  0x64   :  { %p3131_p0 = pnand %p3129_p13, %p3126_p12 }
  0x66   :  { %3134 = shalt.err (!%p3131_p0)
}
  0x67   :  { %s3135_s3 = scalar_lea.vmem %s81_s30, 32  ;;  %p3140_p2 = scmp.lt.s32.totalorder %s81_s30, %s81_s30 }
  0x68   :  { %p3136_p1 = scmp.ne.s32.totalorder %s81_s30, %s3135_s3  ;;  %p3141_p3 = scmp.lt.s32.totalorder %s3135_s3, %s3135_s3 }
  0x6a   :  { %p3142_p4 = por %p3141_p3, %p3140_p2 }
  0x6c   :  { %p3143_p5 = pnand %p3142_p4, %p3136_p1 }
  0x6e   :  { %3146 = shalt.err (!%p3143_p5)
}
  0x6f   :  { %83 = dma.hbm_to_vmem [thread:$0]  %s3758_s6, 32, %s81_s30, [#allocation11]  }
  0x70   :  { %s3147_s19 = scalar_lea.hbm %s3768_s16, 32 }
  0x71   :  { %p3148_p6 = scmp.ne.s32.totalorder %s3768_s16, %s3147_s19  ;;  %p3151_p7 = scmp.lt.u32.totalorder %s3147_s19, %s3768_s16 }
  0x73   :  { %p3153_p8 = pnand %p3151_p7, %p3148_p6 }
  0x75   :  { %3156 = shalt.err (!%p3153_p8)
}
  0x76   :  { %s3157_s24 = scalar_lea.vmem %s115_s25, 32  ;;  %p3162_p10 = scmp.lt.s32.totalorder %s115_s25, %s115_s25 }
  0x77   :  { %p3158_p9 = scmp.ne.s32.totalorder %s115_s25, %s3157_s24  ;;  %p3163_p11 = scmp.lt.s32.totalorder %s3157_s24, %s3157_s24 }
  0x79   :  { %p3164_p12 = por %p3163_p11, %p3162_p10 }
  0x7b   :  { %p3165_p13 = pnand %p3164_p12, %p3158_p9 }
  0x7d   :  { %3168 = shalt.err (!%p3165_p13)
}
  0x7e   :  { %117 = dma.hbm_to_vmem [thread:$0]  %s3768_s16, 32, %s115_s25, [#allocation14]  }
  0x7f   :  { %3169 = dma.done.wait [#allocation6], 1024  }
  0x80   :  { %3170 = vsyncadd [#allocation6], 4294966272 }
  0x81   :  { %3171 = dma.done.wait [#allocation8], 2064  }
  0x82   :  { %3172 = vsyncadd [#allocation8], 4294965232 }
  0x83   :  { %3173 = dma.done.wait [#allocation11], 64  }
  0x84   :  { %3174 = vsyncadd [#allocation11], 4294967232 }
  0x85   :  { %3175 = dma.done.wait [#allocation14], 8224  }
  0x86   :  { %3176 = vsyncadd [#allocation14], 4294959072  ;;  %s144_s26 = sld [smem:[#allocation0]]   ;;  %s3194_s28 = smov 1024   ;;  %v3195_v0 = vmov 0.0   ;;  %vm3196_vm0 = vmmov 0  }
  0x87   :  { %156 = sst [smem:[#allocation17]] %s3194_s28  ;;  %2773 = vmatprep.subr.bf16.mxu0 %v3195_v0  ;;  %2789 = vmatprep.mubr.msk.bf16.mxu0 %vm3196_vm0, %v3195_v0  ;;  %s3197_s16 = smov [#allocation2]   ;;  %v3205_v27 = vmov 0  }
  0x88   :  { %158 = sst [smem:[#allocation17 + $0x1]] %s3194_s28  ;;  %s152_s25 = sshll.u32 %s3197_s16, 4  ;;  %467 = vmatprep.mubr.bf16.mxu1 %v3205_v27  ;;  %s153_s25 = int_to_ptr.vmem [resolvable:$true] %s152_s25 }
  0x89   :  { %160 = sst [smem:[#allocation17 + $0x2]] %s3191_s21  ;;  %s3198_s3 = smov 512  }
  0x8a   :  { %162 = sst [smem:[#allocation17 + $0x3]] %s3187_s7  ;;  %s3199_s0 = smov 2  }
  0x8b   :  { %164 = sst [smem:[#allocation17 + $0x4]] %s3190_s2  ;;  %s3200_s27 = smov [#allocation4]  }
  0x8c   :  { %168 = sst [smem:[#allocation17 + $0x6]] %s3198_s3  ;;  %s2667_s18 = sshll.u32 %s144_s26, 26 }
  0x8d   :  { %170 = sst [smem:[#allocation17 + $0x7]] %s3187_s7  ;;  %s2668_s29 = sadd.s32 134217728, %s2667_s18 }
  0x8e   :  { %172 = sst [smem:[#allocation17 + $0x8]] %s3188_s20  ;;  %s3201_s19 = smov [#allocation16]  }
  0x8f   :  { %166 = sst [smem:[#allocation17 + $0x5]] %s3199_s0  ;;  %s3776_s1 = smov 256  }
  0x90   :  { %174 = dma.general %s3763_s11, 32768, %s153_s25, %s3200_s27, %s3201_s19, [#allocation17], %s2668_s29, 0  }
  0x91   :  { %191 = sst [smem:[#allocation19]] %s3776_s1  ;;  %s3202_s22 = smov [#allocation3]  }
  0x92   :  { %193 = sst [smem:[#allocation19 + $0x1]] %s3776_s1  ;;  %s187_s23 = sshll.u32 %s3202_s22, 4  ;;  %s188_s23 = int_to_ptr.vmem [resolvable:$true] %s187_s23 }
  0x93   :  { %195 = sst [smem:[#allocation19 + $0x2]] %s3199_s0  ;;  %s3203_s11 = smov [#allocation4 + $0x1]  }
  0x94   :  { %197 = sst [smem:[#allocation19 + $0x3]] %s3187_s7  ;;  %s3204_s24 = smov [#allocation18]  }
  0x95   :  { %199 = sst [smem:[#allocation19 + $0x4]] %s3190_s2 }
  0x96   :  { %201 = sst [smem:[#allocation19 + $0x5]] %s3199_s0 }
  0x97   :  { %203 = sst [smem:[#allocation19 + $0x6]] %s3190_s2 }
  0x98   :  { %205 = sst [smem:[#allocation19 + $0x7]] %s3187_s7 }
  0x99   :  { %207 = sst [smem:[#allocation19 + $0x8]] %s3188_s20 }
  0x9a   :  { %209 = dma.general %s3767_s15, 16384, %s188_s23, %s3203_s11, %s3204_s24, [#allocation19], %s2668_s29, 0  }
  0x9b   :  { %v2855_v1 = vld [vmem:[#allocation5] sm:$0xff]   ;;  %v2856_v2 = vld [vmem:[#allocation5 + $0x8] sm:$0xff]   ;;  %v2857_v3 = vld [vmem:[#allocation5 + $0x10] sm:$0xff]   ;;  %s3777_s20 = sld [smem:[#allocation26_spill]] }
  0x9c   :  { %2774 = vmatpush3.bf16.msra.mxu0 %v2855_v1  ;;  %v2863_v4 = vld [vmem:[#allocation9 + $0x4] ss:$8 sps:$4 sm:$0xff]   ;;  %v2865_v5 = vld [vmem:[#allocation9] ss:$8 sps:$4 sm:$0xff]   ;;  %v2858_v6 = vld [vmem:[#allocation5 + $0x18] sm:$0xff]  }
  0x9d   :  { %2775 = vmatprep.subr.bf16.mxu0 %v3195_v0  ;;  %v2866_v7 = vld [vmem:[#allocation9 + $0x14] ss:$8 sps:$4 sm:$0xff]   ;;  %435 = vmatprep.subr.bf16.mxu1 %v2863_v4  ;;  %v2868_v8 = vld [vmem:[#allocation9 + $0x10] ss:$8 sps:$4 sm:$0xff]   ;;  %v2869_v9 = vld [vmem:[#allocation9 + $0x24] ss:$8 sps:$4 sm:$0xff]  }
  0x9e   :  { %436 = vmatpush1.bf16.msra.mxu1 %v2865_v5  ;;  %v2859_v10 = vld [vmem:[#allocation5 + $0x20] sm:$0xff]   ;;  %v2860_v11 = vld [vmem:[#allocation5 + $0x28] sm:$0xff]   ;;  %v2874_v14 = vld [vmem:[#allocation9 + $0x30] ss:$8 sps:$4 sm:$0xff]  }
  0x9f   :  { %437 = vmatprep.subr.bf16.mxu1 %v2866_v7  ;;  %v2871_v12 = vld [vmem:[#allocation9 + $0x20] ss:$8 sps:$4 sm:$0xff]   ;;  %v2872_v13 = vld [vmem:[#allocation9 + $0x34] ss:$8 sps:$4 sm:$0xff]   ;;  %v2875_v15 = vld [vmem:[#allocation9 + $0x44] ss:$8 sps:$4 sm:$0xff]  }
  0xa0   :  { %2776 = vmatpush3.bf16.msra.mxu0 %v2856_v2  ;;  %v2861_v16 = vld [vmem:[#allocation5 + $0x30] sm:$0xff]   ;;  %v2877_v17 = vld [vmem:[#allocation9 + $0x40] ss:$8 sps:$4 sm:$0xff]   ;;  %v2862_v19 = vld [vmem:[#allocation5 + $0x38] sm:$0xff]  }
  0xa1   :  { %2777 = vmatprep.subr.bf16.mxu0 %v3195_v0  ;;  %v2878_v18 = vld [vmem:[#allocation9 + $0x54] ss:$8 sps:$4 sm:$0xff]   ;;  %v2880_v21 = vld [vmem:[#allocation9 + $0x50] ss:$8 sps:$4 sm:$0xff]   ;;  %v2881_v23 = vld [vmem:[#allocation9 + $0x64] ss:$8 sps:$4 sm:$0xff]  }
  0xa2   :  { %438 = vmatpush1.bf16.msra.mxu1 %v2868_v8  ;;  %v210_v20 = vld [vmem:[%s3777_s20] sm:$0xff]  ;;  %v2883_v24 = vld [vmem:[#allocation9 + $0x60] ss:$8 sps:$4 sm:$0xff]   ;;  %v2671_v28 = vld [vmem:[#allocation7] ss:$0 sm:$0xff] }
  0xa3   :  { %439 = vmatprep.subr.bf16.mxu1 %v2869_v9  ;;  %v211_v22 = vpack.c.bf16 %v210_v20, %v210_v20  ;;  %v2884_v25 = vld [vmem:[#allocation9 + $0x74] ss:$8 sps:$4 sm:$0xff]   ;;  %v2886_v26 = vld [vmem:[#allocation9 + $0x70] ss:$8 sps:$4 sm:$0xff]   ;;  %v343_v9 = vld [vmem:[#allocation10] sm:$0x3] }
  0xa4   :  { %2778 = vmatpush3.bf16.msra.mxu0 %v2857_v3  ;;  %v2889_v37 = vld [vmem:[#allocation13 + $0x4] ss:$16 sps:$4 sm:$0xff]   ;;  %v2887_v38 = vld [vmem:[#allocation13] ss:$16 sps:$4 sm:$0xff]   ;;  %v2937_v5 = vld [vmem:[#allocation13 + $0xc] ss:$16 sps:$4 sm:$0xff]  }
  0xa5   :  { %2779 = vmatprep.subr.bf16.mxu0 %v3195_v0  ;;  %v2892_v39 = vld [vmem:[#allocation13 + $0x24] ss:$16 sps:$4 sm:$0xff]   ;;  %v2890_v40 = vld [vmem:[#allocation13 + $0x20] ss:$16 sps:$4 sm:$0xff]  }
  0xa6   :  { %440 = vmatpush1.bf16.msra.mxu1 %v2871_v12  ;;  %v2895_v41 = vld [vmem:[#allocation13 + $0x44] ss:$16 sps:$4 sm:$0xff]   ;;  %v2893_v42 = vld [vmem:[#allocation13 + $0x40] ss:$16 sps:$4 sm:$0xff]  }
  0xa7   :  { %441 = vmatprep.subr.bf16.mxu1 %v2872_v13  ;;  %v2898_v43 = vld [vmem:[#allocation13 + $0x64] ss:$16 sps:$4 sm:$0xff]   ;;  %v2896_v44 = vld [vmem:[#allocation13 + $0x60] ss:$16 sps:$4 sm:$0xff]  }
  0xa8   :  { %2780 = vmatpush3.bf16.msra.mxu0 %v2858_v6  ;;  %v2901_v45 = vld [vmem:[#allocation13 + $0x84] ss:$16 sps:$4 sm:$0xff]   ;;  %v2899_v46 = vld [vmem:[#allocation13 + $0x80] ss:$16 sps:$4 sm:$0xff]   ;;  %v345_v6 = vlaneseq }
  0xa9   :  { %2781 = vmatprep.subr.bf16.mxu0 %v3195_v0  ;;  %v2904_v47 = vld [vmem:[#allocation13 + $0xa4] ss:$16 sps:$4 sm:$0xff]   ;;  %v2902_v48 = vld [vmem:[#allocation13 + $0xa0] ss:$16 sps:$4 sm:$0xff]  }
  0xaa   :  { %442 = vmatpush1.bf16.msra.mxu1 %v2874_v14  ;;  %v2907_v49 = vld [vmem:[#allocation13 + $0xc4] ss:$16 sps:$4 sm:$0xff]   ;;  %v2905_v50 = vld [vmem:[#allocation13 + $0xc0] ss:$16 sps:$4 sm:$0xff]   ;;  %v3419_v7 = vshrl.u32 %v345_v6, 7 }
  0xab   :  { %443 = vmatprep.subr.bf16.mxu1 %v2875_v15  ;;  %v2910_v51 = vld [vmem:[#allocation13 + $0xe4] ss:$16 sps:$4 sm:$0xff]   ;;  %v2908_v52 = vld [vmem:[#allocation13 + $0xe0] ss:$16 sps:$4 sm:$0xff]  }
  0xac   :  { %2782 = vmatpush3.bf16.msra.mxu0 %v2859_v10  ;;  %v2913_v53 = vld [vmem:[#allocation13 + $0x104] ss:$16 sps:$4 sm:$0xff]   ;;  %v2911_v54 = vld [vmem:[#allocation13 + $0x100] ss:$16 sps:$4 sm:$0xff]   ;;  %v3422_v8 = vsub.s32 0, %v3419_v7  ;;  %v3425_v10 = vsub.s32 1, %v3419_v7 }
  0xad   :  { %2783 = vmatprep.subr.bf16.mxu0 %v3195_v0  ;;  %v2916_v55 = vld [vmem:[#allocation13 + $0x124] ss:$16 sps:$4 sm:$0xff]   ;;  %v2914_v56 = vld [vmem:[#allocation13 + $0x120] ss:$16 sps:$4 sm:$0xff]  }
  0xae   :  { %444 = vmatpush1.bf16.msra.mxu1 %v2877_v17  ;;  %v2919_v57 = vld [vmem:[#allocation13 + $0x144] ss:$16 sps:$4 sm:$0xff]   ;;  %v2917_v58 = vld [vmem:[#allocation13 + $0x140] ss:$16 sps:$4 sm:$0xff]   ;;  %v352_v12 = vrot.slane %v343_v9, %v3425_v10 }
  0xaf   :  { %445 = vmatprep.subr.bf16.mxu1 %v2878_v18  ;;  %v2922_v59 = vld [vmem:[#allocation13 + $0x164] ss:$16 sps:$4 sm:$0xff]   ;;  %v2920_v60 = vld [vmem:[#allocation13 + $0x160] ss:$16 sps:$4 sm:$0xff]  }
  0xb0   :  { %2784 = vmatpush3.bf16.msra.mxu0 %v2860_v11  ;;  %v2925_v61 = vld [vmem:[#allocation13 + $0x184] ss:$16 sps:$4 sm:$0xff]   ;;  %v2923_v62 = vld [vmem:[#allocation13 + $0x180] ss:$16 sps:$4 sm:$0xff]   ;;  %v348_v11 = vrot.slane %v343_v9, %v3422_v8 }
  0xb1   :  { %2785 = vmatprep.subr.bf16.mxu0 %v3195_v0  ;;  %v2926_v63 = vld [vmem:[#allocation13 + $0x1a0] ss:$16 sps:$4 sm:$0xff]   ;;  %v2931_v1 = vld [vmem:[#allocation13 + $0x1c4] ss:$16 sps:$4 sm:$0xff]  }
  0xb2   :  { %446 = vmatpush1.bf16.msra.mxu1 %v2880_v21  ;;  %v2929_v2 = vld [vmem:[#allocation13 + $0x1c0] ss:$16 sps:$4 sm:$0xff]   ;;  %v2934_v3 = vld [vmem:[#allocation13 + $0x1e4] ss:$16 sps:$4 sm:$0xff]  }
  0xb3   :  { %447 = vmatprep.subr.bf16.mxu1 %v2881_v23  ;;  %v2932_v4 = vld [vmem:[#allocation13 + $0x1e0] ss:$16 sps:$4 sm:$0xff]  }
  0xb4   :  { %2786 = vmatpush3.bf16.msra.mxu0 %v2861_v16 }
  0xb5   :  { %2787 = vmatprep.subr.bf16.mxu0 %v3195_v0  ;;  %v2928_v0 = vld [vmem:[#allocation13 + $0x1a4] ss:$16 sps:$4 sm:$0xff]  }
  0xb6   :  { %448 = vmatpush1.bf16.msra.mxu1 %v2883_v24 }
  0xb7   :  { %449 = vmatprep.subr.bf16.mxu1 %v2884_v25 }
  0xb8   :  { %2788 = vmatpush3.bf16.msra.mxu0 %v2862_v19 }
  0xba   :  { %450 = vmatpush1.bf16.msra.mxu1 %v2886_v26 }
  0xbb   :  { %2790 = vmatmul.mubr.bf16.vlgmr.msra.gmra.mrb[0].mxu0 %v211_v22  ;;  %997 = vmatprep.subr.bf16.mxu1 %v2889_v37 }
 0x18e   :  { %v317_v29 = vpop.f32.mrb[0].mxu0 }
 0x18f   :  { %v318_v30 = vadd.f32 %v2671_v28, %v317_v29  ;;  %v2791_v31 = vpop.f32.mrb[1].mxu0 }
 0x190   :  { %v320_v32 = vpop.f32.mrb[2].mxu0 }
 0x191   :  { %vm323_vm1 = vcmp.gt.f32.partialorder %v318_v30, 0.0  ;;  %v324_v33 = vmul.f32 0.2, %v318_v30  ;;  %v2792_v34 = vpop.f32.mrb[3].mxu0 }
 0x193   :  { %v325_v35 = vsel %vm323_vm1, %v318_v30, %v324_v33 }
 0x194   :  { %v326_v36 = vpack.c.bf16 %v325_v35, %v325_v35 }
 0x196   :  { %468 = vmatmul.mubr.bf16.vlgmr.msra.gmra.mrb[0].mxu1 %v326_v36 }
 0x197   :  { %998 = vmatpush1.bf16.msra.mxu1 %v2887_v38 }
 0x198   :  { %999 = vmatprep.subr.bf16.mxu1 %v2892_v39 }
 0x19b   :  { %1000 = vmatpush1.bf16.msra.mxu1 %v2890_v40 }
 0x19c   :  { %1001 = vmatprep.subr.bf16.mxu1 %v2895_v41 }
 0x19f   :  { %1002 = vmatpush1.bf16.msra.mxu1 %v2893_v42 }
 0x1a0   :  { %1003 = vmatprep.subr.bf16.mxu1 %v2898_v43 }
 0x1a3   :  { %1004 = vmatpush1.bf16.msra.mxu1 %v2896_v44 }
 0x1a4   :  { %1005 = vmatprep.subr.bf16.mxu1 %v2901_v45 }
 0x1a7   :  { %1006 = vmatpush1.bf16.msra.mxu1 %v2899_v46 }
 0x1a8   :  { %1007 = vmatprep.subr.bf16.mxu1 %v2904_v47 }
 0x1ab   :  { %1008 = vmatpush1.bf16.msra.mxu1 %v2902_v48 }
 0x1ac   :  { %1009 = vmatprep.subr.bf16.mxu1 %v2907_v49 }
 0x1af   :  { %1010 = vmatpush1.bf16.msra.mxu1 %v2905_v50 }
 0x1b0   :  { %1011 = vmatprep.subr.bf16.mxu1 %v2910_v51 }
 0x1b3   :  { %1012 = vmatpush1.bf16.msra.mxu1 %v2908_v52 }
 0x1b4   :  { %1013 = vmatprep.subr.bf16.mxu1 %v2913_v53 }
 0x1b7   :  { %1014 = vmatpush1.bf16.msra.mxu1 %v2911_v54 }
 0x1b8   :  { %1015 = vmatprep.subr.bf16.mxu1 %v2916_v55  ;;  %v3206_v55 = vmov 1966171168  }
 0x1bb   :  { %1016 = vmatpush1.bf16.msra.mxu1 %v2914_v56  ;;  %v520_v56 = vunpack.c.l.s4 %v3206_v55  ;;  %v2982_v55 = vld [vmem:[#allocation13 + $0x1ec] ss:$16 sps:$4 sm:$0xff]  }
 0x1bc   :  { %1017 = vmatprep.subr.bf16.mxu1 %v2919_v57 }
 0x1bd   :  { %v521_v57 = vunpack.c.0.s8 %v520_v56  ;;  %v2980_v56 = vld [vmem:[#allocation13 + $0x1e8] ss:$16 sps:$4 sm:$0xff]  }
 0x1bf   :  { %1018 = vmatpush1.bf16.msra.mxu1 %v2917_v58 }
 0x1c0   :  { %1019 = vmatprep.subr.bf16.mxu1 %v2922_v59  ;;  %v3430_v59 = vsub.s32 %v521_v57, %v3419_v7  ;;  %v655_v57 = vld [vmem:[%s3760_s8] sm:$0xf] }
 0x1c3   :  { %1020 = vmatpush1.bf16.msra.mxu1 %v2920_v60 }
 0x1c4   :  { %1021 = vmatprep.subr.bf16.mxu1 %v2925_v61 }
 0x1c7   :  { %1022 = vmatpush1.bf16.msra.mxu1 %v2923_v62 }
 0x1c8   :  { %1023 = vmatprep.subr.bf16.mxu1 %v2928_v0 }
 0x1cb   :  { %1024 = vmatpush1.bf16.msra.mxu1 %v2926_v63  ;;  %v515_v63 = vld [vmem:[%s3757_s5] sm:$0x3] }
 0x1cc   :  { %1025 = vmatprep.subr.bf16.mxu1 %v2931_v1 }
 0x1cf   :  { %1026 = vmatpush1.bf16.msra.mxu1 %v2929_v2 }
 0x1d0   :  { %1027 = vmatprep.subr.bf16.mxu1 %v2934_v3 }
 0x1d3   :  { %1028 = vmatpush1.bf16.msra.mxu1 %v2932_v4 }
 0x1d4   :  { %1038 = vmatprep.subr.bf16.mxu1 %v2937_v5 }
 0x269   :  { %v469_v13 = vpop.f32.mrb[0].mxu1 }
 0x26a   :  { %v470_v14 = vadd.f32 %v469_v13, %v348_v11  ;;  %v471_v15 = vpop.f32.mrb[1].mxu1  ;;  %v535_v13 = vld [vmem:[#allocation12] sm:$0x3] }
 0x26b   :  { %v472_v16 = vadd.f32 %v471_v15, %v352_v12  ;;  %v473_v17 = vpop.f32.mrb[2].mxu1 }
 0x26c   :  { %v476_v18 = vrot.slane %v470_v14, 4  ;;  %v491_v19 = vmul.f32 %v470_v14, %v470_v14  ;;  %v474_v20 = vpop.f32.mrb[3].mxu1 }
 0x26d   :  { %v482_v21 = vrot.slane %v472_v16, 4  ;;  %v492_v22 = vmul.f32 %v472_v16, %v472_v16 }
 0x26e   :  { %v477_v23 = vadd.f32 %v476_v18, %v470_v14  ;;  %v493_v24 = vrot.slane %v491_v19, 4 }
 0x26f   :  { %v483_v25 = vadd.f32 %v482_v21, %v472_v16  ;;  %v499_v26 = vrot.slane %v492_v22, 4 }
 0x270   :  { %v478_v27 = vrot.slane %v477_v23, 2  ;;  %v494_v28 = vadd.f32 %v493_v24, %v491_v19 }
 0x271   :  { %v484_v29 = vrot.slane %v483_v25, 2  ;;  %v500_v30 = vadd.f32 %v499_v26, %v492_v22 }
 0x272   :  { %v479_v31 = vadd.f32 %v478_v27, %v477_v23  ;;  %v495_v32 = vrot.slane %v494_v28, 2  ;;  %v2940_v27 = vld [vmem:[#allocation13 + $0x2c] ss:$16 sps:$4 sm:$0xff]  }
 0x273   :  { %v485_v33 = vadd.f32 %v484_v29, %v483_v25  ;;  %v501_v34 = vrot.slane %v500_v30, 2  ;;  %v2935_v25 = vld [vmem:[#allocation13 + $0x8] ss:$16 sps:$4 sm:$0xff]   ;;  %v2943_v29 = vld [vmem:[#allocation13 + $0x4c] ss:$16 sps:$4 sm:$0xff]  }
 0x274   :  { %v480_v35 = vrot.slane %v479_v31, 1  ;;  %v496_v36 = vadd.f32 %v495_v32, %v494_v28  ;;  %v2938_v28 = vld [vmem:[#allocation13 + $0x28] ss:$16 sps:$4 sm:$0xff]  }
 0x275   :  { %v486_v37 = vrot.slane %v485_v33, 1  ;;  %v502_v38 = vadd.f32 %v501_v34, %v500_v30  ;;  %v2941_v30 = vld [vmem:[#allocation13 + $0x48] ss:$16 sps:$4 sm:$0xff]  }
 0x276   :  { %v481_v39 = vadd.f32 %v480_v35, %v479_v31  ;;  %v497_v40 = vrot.slane %v496_v36, 1  ;;  %v2946_v31 = vld [vmem:[#allocation13 + $0x6c] ss:$16 sps:$4 sm:$0xff]   ;;  %v2944_v32 = vld [vmem:[#allocation13 + $0x68] ss:$16 sps:$4 sm:$0xff]  }
 0x277   :  { %v487_v41 = vadd.f32 %v486_v37, %v485_v33  ;;  %v503_v42 = vrot.slane %v502_v38, 1  ;;  %v2949_v33 = vld [vmem:[#allocation13 + $0x8c] ss:$16 sps:$4 sm:$0xff]   ;;  %v2947_v34 = vld [vmem:[#allocation13 + $0x88] ss:$16 sps:$4 sm:$0xff]  }
 0x278   :  { %v489_v43 = vmul.f32 0.125, %v481_v39  ;;  %v498_v44 = vadd.f32 %v497_v40, %v496_v36  ;;  %v2952_v35 = vld [vmem:[#allocation13 + $0xac] ss:$16 sps:$4 sm:$0xff]   ;;  %v2950_v36 = vld [vmem:[#allocation13 + $0xa8] ss:$16 sps:$4 sm:$0xff]  }
 0x279   :  { %v490_v45 = vmul.f32 0.125, %v487_v41  ;;  %v504_v46 = vadd.f32 %v503_v42, %v502_v38  ;;  %v2955_v37 = vld [vmem:[#allocation13 + $0xcc] ss:$16 sps:$4 sm:$0xff]   ;;  %v2953_v38 = vld [vmem:[#allocation13 + $0xc8] ss:$16 sps:$4 sm:$0xff]  }
 0x27a   :  { %v505_v47 = vmul.f32 0.125, %v498_v44  ;;  %v507_v48 = vmul.f32 %v489_v43, %v489_v43  ;;  %v2958_v39 = vld [vmem:[#allocation13 + $0xec] ss:$16 sps:$4 sm:$0xff]   ;;  %v2956_v40 = vld [vmem:[#allocation13 + $0xe8] ss:$16 sps:$4 sm:$0xff]  }
 0x27b   :  { %v506_v49 = vmul.f32 0.125, %v504_v46  ;;  %v508_v50 = vmul.f32 %v490_v45, %v490_v45  ;;  %v2961_v41 = vld [vmem:[#allocation13 + $0x10c] ss:$16 sps:$4 sm:$0xff]   ;;  %v2959_v42 = vld [vmem:[#allocation13 + $0x108] ss:$16 sps:$4 sm:$0xff]  }
 0x27c   :  { %v509_v51 = vsub.f32 %v505_v47, %v507_v48  ;;  %v2962_v44 = vld [vmem:[#allocation13 + $0x128] ss:$16 sps:$4 sm:$0xff]   ;;  %v2970_v47 = vld [vmem:[#allocation13 + $0x16c] ss:$16 sps:$4 sm:$0xff]  }
 0x27d   :  { %v510_v52 = vsub.f32 %v506_v49, %v508_v50  ;;  %v2965_v46 = vld [vmem:[#allocation13 + $0x148] ss:$16 sps:$4 sm:$0xff]   ;;  %v2973_v49 = vld [vmem:[#allocation13 + $0x18c] ss:$16 sps:$4 sm:$0xff]  }
 0x27e   :  { %v511_v53 = vadd.f32 0.8, %v509_v51  ;;  %v2968_v48 = vld [vmem:[#allocation13 + $0x168] ss:$16 sps:$4 sm:$0xff]   ;;  %v2976_v51 = vld [vmem:[#allocation13 + $0x1ac] ss:$16 sps:$4 sm:$0xff]  }
 0x27f   :  { %v512_v54 = vadd.f32 0.8, %v510_v52  ;;  %v2971_v50 = vld [vmem:[#allocation13 + $0x188] ss:$16 sps:$4 sm:$0xff]  }
 0x280   :  { %2983 = vrsqrt.f32 %v511_v53  ;;  %v2974_v52 = vld [vmem:[#allocation13 + $0x1a8] ss:$16 sps:$4 sm:$0xff]   ;;  %v2979_v53 = vld [vmem:[#allocation13 + $0x1cc] ss:$16 sps:$4 sm:$0xff]  }
 0x281   :  { %2985 = vrsqrt.f32 %v512_v54  ;;  %v2977_v54 = vld [vmem:[#allocation13 + $0x1c8] ss:$16 sps:$4 sm:$0xff]  }
 0x28a   :  { %v2984_v58 = vpop.eup %2983 }
 0x28b   :  { %v2986_v60 = vpop.eup %2985 }
 0x28c   :  { %v518_v61 = vcombine.low %v2984_v58, %v2986_v60  ;;  %v660_v58 = vrot.slane %v655_v57, %v3422_v8  ;;  %v664_v60 = vrot.slane %v655_v57, %v3425_v10 }
 0x28e   :  { %v525_v62 = vrot.slane %v518_v61, %v3430_v59 }
 0x290   :  { %v532_v0 = vrot.slane %v525_v62, %v3430_v59 }
 0x292   :  { %v534_v1 = vmul.f32 %v532_v0, %v515_v63 }
 0x294   :  { %v540_v2 = vrot.slane %v534_v1, %v3422_v8  ;;  %v544_v3 = vrot.slane %v534_v1, %v3425_v10 }
 0x296   :  { %v547_v4 = vmul.f32 %v540_v2, %v489_v43  ;;  %v548_v5 = vmul.f32 %v544_v3, %v490_v45  ;;  %v569_v6 = vmul.f32 %v544_v3, %v472_v16  ;;  %v568_v9 = vmul.f32 %v540_v2, %v470_v14  ;;  %v2964_v43 = vld [vmem:[#allocation13 + $0x12c] ss:$16 sps:$4 sm:$0xff]  }
 0x297   :  { %v2967_v45 = vld [vmem:[#allocation13 + $0x14c] ss:$16 sps:$4 sm:$0xff]  }
 0x298   :  { %v551_v11 = vcombine.low %v547_v4, %v548_v5 }
 0x29a   :  { %v558_v12 = vrot.slane %v551_v11, %v3430_v59 }
 0x29c   :  { %v565_v15 = vrot.slane %v558_v12, %v3430_v59 }
 0x29e   :  { %v567_v17 = vsub.f32 %v535_v13, %v565_v15 }
 0x2a0   :  { %v578_v18 = vrot.slane %v567_v17, %v3425_v10  ;;  %v574_v19 = vrot.slane %v567_v17, %v3422_v8 }
 0x2a2   :  { %v582_v20 = vadd.f32 %v578_v18, %v569_v6  ;;  %v581_v21 = vadd.f32 %v574_v19, %v568_v9 }
 0x2a4   :  { %vm584_vm2 = vcmp.gt.f32.partialorder %v582_v20, 0.0  ;;  %v586_v22 = vmul.f32 0.2, %v582_v20  ;;  %vm583_vm3 = vcmp.gt.f32.partialorder %v581_v21, 0.0  ;;  %v585_v23 = vmul.f32 0.2, %v581_v21 }
 0x2a6   :  { %v588_v24 = vsel %vm584_vm2, %v582_v20, %v586_v22  ;;  %v587_v16 = vsel %vm583_vm3, %v581_v21, %v585_v23 }
 0x2a7   :  { %v590_v14 = vpack.c.bf16 %v588_v24, %v588_v24  ;;  %v3443_v26 = vpack.c.bf16 %v587_v16, %v587_v16 }
 0x2a9   :  { %1029 = vmatprep.mubr.bf16.mxu1 %v590_v14 }
 0x2aa   :  { %1030 = vmatmul.mubr.bf16.vlgmr.msra.gmra.mrb[4].mxu1 %v3443_v26 }
 0x2ab   :  { %1039 = vmatpush1.bf16.msra.mxu1 %v2935_v25  ;;  %1070 = vmatprep.mubr.bf16.mxu1 %v590_v14 }
 0x2ac   :  { %1040 = vmatprep.subr.bf16.mxu1 %v2940_v27 }
 0x2af   :  { %1041 = vmatpush1.bf16.msra.mxu1 %v2938_v28 }
 0x2b0   :  { %1042 = vmatprep.subr.bf16.mxu1 %v2943_v29 }
 0x2b3   :  { %1043 = vmatpush1.bf16.msra.mxu1 %v2941_v30 }
 0x2b4   :  { %1044 = vmatprep.subr.bf16.mxu1 %v2946_v31 }
 0x2b7   :  { %1045 = vmatpush1.bf16.msra.mxu1 %v2944_v32 }
 0x2b8   :  { %1046 = vmatprep.subr.bf16.mxu1 %v2949_v33 }
 0x2bb   :  { %1047 = vmatpush1.bf16.msra.mxu1 %v2947_v34 }
 0x2bc   :  { %1048 = vmatprep.subr.bf16.mxu1 %v2952_v35 }
 0x2bf   :  { %1049 = vmatpush1.bf16.msra.mxu1 %v2950_v36 }
 0x2c0   :  { %1050 = vmatprep.subr.bf16.mxu1 %v2955_v37 }
 0x2c3   :  { %1051 = vmatpush1.bf16.msra.mxu1 %v2953_v38 }
 0x2c4   :  { %1052 = vmatprep.subr.bf16.mxu1 %v2958_v39 }
 0x2c7   :  { %1053 = vmatpush1.bf16.msra.mxu1 %v2956_v40 }
 0x2c8   :  { %1054 = vmatprep.subr.bf16.mxu1 %v2961_v41 }
 0x2cb   :  { %1055 = vmatpush1.bf16.msra.mxu1 %v2959_v42 }
 0x2cc   :  { %1056 = vmatprep.subr.bf16.mxu1 %v2964_v43 }
 0x2cf   :  { %1057 = vmatpush1.bf16.msra.mxu1 %v2962_v44 }
 0x2d0   :  { %1058 = vmatprep.subr.bf16.mxu1 %v2967_v45  ;;  %v3473_v45 = vsub.s32 2, %v3419_v7 }
 0x2d3   :  { %1059 = vmatpush1.bf16.msra.mxu1 %v2965_v46  ;;  %v3476_v46 = vsub.s32 3, %v3419_v7 }
 0x2d4   :  { %1060 = vmatprep.subr.bf16.mxu1 %v2970_v47  ;;  %v668_v47 = vrot.slane %v655_v57, %v3473_v45 }
 0x2d7   :  { %1061 = vmatpush1.bf16.msra.mxu1 %v2968_v48  ;;  %v672_v48 = vrot.slane %v655_v57, %v3476_v46 }
 0x2d8   :  { %1062 = vmatprep.subr.bf16.mxu1 %v2973_v49 }
 0x2db   :  { %1063 = vmatpush1.bf16.msra.mxu1 %v2971_v50 }
 0x2dc   :  { %1064 = vmatprep.subr.bf16.mxu1 %v2976_v51 }
 0x2df   :  { %1065 = vmatpush1.bf16.msra.mxu1 %v2974_v52 }
 0x2e0   :  { %1066 = vmatprep.subr.bf16.mxu1 %v2979_v53 }
 0x2e3   :  { %1067 = vmatpush1.bf16.msra.mxu1 %v2977_v54 }
 0x2e4   :  { %1068 = vmatprep.subr.bf16.mxu1 %v2982_v55 }
 0x2e7   :  { %1069 = vmatpush1.bf16.msra.mxu1 %v2980_v56 }
 0x2ea   :  { %1071 = vmatmul.mubr.bf16.vlgmr.msra.gmra.mrb[8].mxu1 %v3443_v26 }
 0x37d   :  { %v1031_v61 = vpop.f32.mrb[4].mxu1 }
 0x37e   :  { %v3452_v62 = vadd.f32 %v1031_v61, %v660_v58  ;;  %v1033_v63 = vpop.f32.mrb[5].mxu1 }
 0x37f   :  { %v3454_v0 = vadd.f32 %v1033_v63, %v664_v60  ;;  %v1035_v1 = vpop.f32.mrb[6].mxu1 }
 0x380   :  { %v1079_v2 = vrot.slane %v3452_v62, 4  ;;  %v1107_v3 = vmul.f32 %v3452_v62, %v3452_v62  ;;  %v1036_v4 = vpop.f32.mrb[7].mxu1 }
 0x381   :  { %v1085_v5 = vrot.slane %v3454_v0, 4  ;;  %v1108_v6 = vmul.f32 %v3454_v0, %v3454_v0 }
 0x382   :  { %v1080_v9 = vadd.f32 %v1079_v2, %v3452_v62  ;;  %v1111_v11 = vrot.slane %v1107_v3, 4 }
 0x383   :  { %v1086_v12 = vadd.f32 %v1085_v5, %v3454_v0  ;;  %v1117_v13 = vrot.slane %v1108_v6, 4 }
 0x384   :  { %v1081_v15 = vrot.slane %v1080_v9, 2  ;;  %v1112_v17 = vadd.f32 %v1111_v11, %v1107_v3 }
 0x385   :  { %v1087_v18 = vrot.slane %v1086_v12, 2  ;;  %v1118_v19 = vadd.f32 %v1117_v13, %v1108_v6 }
 0x386   :  { %v1082_v20 = vadd.f32 %v1081_v15, %v1080_v9  ;;  %v1113_v21 = vrot.slane %v1112_v17, 2 }
 0x387   :  { %v1088_v22 = vadd.f32 %v1087_v18, %v1086_v12  ;;  %v1119_v23 = vrot.slane %v1118_v19, 2 }
 0x388   :  { %v1083_v24 = vrot.slane %v1082_v20, 1  ;;  %v1114_v16 = vadd.f32 %v1113_v21, %v1112_v17 }
 0x389   :  { %v1089_v14 = vrot.slane %v1088_v22, 1  ;;  %v1120_v25 = vadd.f32 %v1119_v23, %v1118_v19 }
 0x38a   :  { %v1084_v26 = vadd.f32 %v1083_v24, %v1082_v20  ;;  %v1115_v27 = vrot.slane %v1114_v16, 1 }
 0x38b   :  { %v1090_v28 = vadd.f32 %v1089_v14, %v1088_v22  ;;  %v1121_v29 = vrot.slane %v1120_v25, 1 }
 0x38c   :  { %v3464_v30 = vmul.f32 0.125, %v1084_v26  ;;  %v1116_v31 = vadd.f32 %v1115_v27, %v1114_v16 }
 0x38d   :  { %v3466_v32 = vmul.f32 0.125, %v1090_v28  ;;  %v1122_v33 = vadd.f32 %v1121_v29, %v1120_v25 }
 0x38e   :  { %v1135_v34 = vmul.f32 0.125, %v1116_v31  ;;  %v1139_v35 = vmul.f32 %v3464_v30, %v3464_v30 }
 0x38f   :  { %v1136_v36 = vmul.f32 0.125, %v1122_v33  ;;  %v1140_v37 = vmul.f32 %v3466_v32, %v3466_v32 }
 0x390   :  { %v1143_v38 = vsub.f32 %v1135_v34, %v1139_v35 }
 0x391   :  { %v1144_v39 = vsub.f32 %v1136_v36, %v1140_v37 }
 0x392   :  { %v1147_v40 = vadd.f32 0.8, %v1143_v38 }
 0x393   :  { %v1148_v41 = vadd.f32 0.8, %v1144_v39 }
 0x394   :  { %2987 = vrsqrt.f32 %v1147_v40 }
 0x395   :  { %2989 = vrsqrt.f32 %v1148_v41  ;;  %v1155_v41 = vld [vmem:[%s3761_s9] sm:$0xf] }
 0x39e   :  { %v2988_v42 = vpop.eup %2987 }
 0x39f   :  { %v2990_v43 = vpop.eup %2989 }
 0x3a0   :  { %v1160_v44 = vcombine.low %v2988_v42, %v2990_v43 }
 0x3a2   :  { %v1168_v38 = vrot.slane %v1160_v44, %v3430_v59 }
 0x3bd   :  { %v1072_v49 = vpop.f32.mrb[8].mxu1 }
 0x3be   :  { %v1073_v50 = vadd.f32 %v1072_v49, %v668_v47  ;;  %v1074_v51 = vpop.f32.mrb[9].mxu1 }
 0x3bf   :  { %v1075_v52 = vadd.f32 %v1074_v51, %v672_v48  ;;  %v1076_v53 = vpop.f32.mrb[10].mxu1 }
 0x3c0   :  { %v1091_v54 = vrot.slane %v1073_v50, 4  ;;  %v1109_v55 = vmul.f32 %v1073_v50, %v1073_v50  ;;  %v1077_v56 = vpop.f32.mrb[11].mxu1 }
 0x3c1   :  { %v1097_v58 = vrot.slane %v1075_v52, 4  ;;  %v1110_v60 = vmul.f32 %v1075_v52, %v1075_v52 }
 0x3c2   :  { %v1092_v61 = vadd.f32 %v1091_v54, %v1073_v50  ;;  %v1123_v63 = vrot.slane %v1109_v55, 4 }
 0x3c3   :  { %v1098_v1 = vadd.f32 %v1097_v58, %v1075_v52  ;;  %v1129_v2 = vrot.slane %v1110_v60, 4 }
 0x3c4   :  { %v1093_v3 = vrot.slane %v1092_v61, 2  ;;  %v1124_v4 = vadd.f32 %v1123_v63, %v1109_v55 }
 0x3c5   :  { %v1099_v5 = vrot.slane %v1098_v1, 2  ;;  %v1130_v6 = vadd.f32 %v1129_v2, %v1110_v60 }
 0x3c6   :  { %v1094_v9 = vadd.f32 %v1093_v3, %v1092_v61  ;;  %v1125_v57 = vrot.slane %v1124_v4, 2 }
 0x3c7   :  { %v1100_v11 = vadd.f32 %v1099_v5, %v1098_v1  ;;  %v1131_v12 = vrot.slane %v1130_v6, 2 }
 0x3c8   :  { %v1095_v13 = vrot.slane %v1094_v9, 1  ;;  %v1126_v15 = vadd.f32 %v1125_v57, %v1124_v4 }
 0x3c9   :  { %v1101_v17 = vrot.slane %v1100_v11, 1  ;;  %v1132_v18 = vadd.f32 %v1131_v12, %v1130_v6 }
 0x3ca   :  { %v1096_v19 = vadd.f32 %v1095_v13, %v1094_v9  ;;  %v1127_v20 = vrot.slane %v1126_v15, 1 }
 0x3cb   :  { %v1102_v21 = vadd.f32 %v1101_v17, %v1100_v11  ;;  %v1133_v22 = vrot.slane %v1132_v18, 1 }
 0x3cc   :  { %v1105_v23 = vmul.f32 0.125, %v1096_v19  ;;  %v1128_v24 = vadd.f32 %v1127_v20, %v1126_v15 }
 0x3cd   :  { %v1106_v16 = vmul.f32 0.125, %v1102_v21  ;;  %v1134_v14 = vadd.f32 %v1133_v22, %v1132_v18 }
 0x3ce   :  { %v1137_v25 = vmul.f32 0.125, %v1128_v24  ;;  %v1141_v26 = vmul.f32 %v1105_v23, %v1105_v23 }
 0x3cf   :  { %v1138_v27 = vmul.f32 0.125, %v1134_v14  ;;  %v1142_v28 = vmul.f32 %v1106_v16, %v1106_v16 }
 0x3d0   :  { %v1145_v29 = vsub.f32 %v1137_v25, %v1141_v26 }
 0x3d1   :  { %v1146_v31 = vsub.f32 %v1138_v27, %v1142_v28 }
 0x3d2   :  { %v1149_v33 = vadd.f32 0.8, %v1145_v29 }
 0x3d3   :  { %v1150_v34 = vadd.f32 0.8, %v1146_v31 }
 0x3d4   :  { %2991 = vrsqrt.f32 %v1149_v33 }
 0x3d5   :  { %2993 = vrsqrt.f32 %v1150_v34 }
 0x3de   :  { %v2992_v35 = vpop.eup %2991 }
 0x3df   :  { %v2994_v36 = vpop.eup %2993 }
 0x3e0   :  { %v1161_v37 = vcombine.low %v2992_v35, %v2994_v36 }
 0x3e2   :  { %v1175_v39 = vrot.slane %v1161_v37, %v3430_v59 }
 0x3e4   :  { %v1176_v40 = vcombine.low %v1168_v38, %v1175_v39 }
 0x3e6   :  { %v1183_v42 = vrot.slane %v1176_v40, %v3430_v59 }
 0x3e8   :  { %v1185_v43 = vmul.f32 %v1183_v42, %v1155_v41 }
 0x3ea   :  { %v1191_v47 = vrot.slane %v1185_v43, %v3422_v8  ;;  %v1195_v48 = vrot.slane %v1185_v43, %v3425_v10  ;;  %v1199_v49 = vrot.slane %v1185_v43, %v3473_v45  ;;  %v1203_v51 = vrot.slane %v1185_v43, %v3476_v46 }
 0x3ec   :  { %v1208_v44 = vmul.f32 %v1191_v47, %v3464_v30  ;;  %v1209_v53 = vmul.f32 %v1195_v48, %v3466_v32  ;;  %v1210_v54 = vmul.f32 %v1199_v49, %v1105_v23  ;;  %v1211_v55 = vmul.f32 %v1203_v51, %v1106_v16  ;;  %v1186_v30 = vld [vmem:[%s3762_s10] sm:$0xf] }
 0x3ed   :  { %v1242_v56 = vmul.f32 %v1191_v47, %v3452_v62  ;;  %v1243_v58 = vmul.f32 %v1195_v48, %v3454_v0  ;;  %v1244_v60 = vmul.f32 %v1199_v49, %v1073_v50  ;;  %v1245_v61 = vmul.f32 %v1203_v51, %v1075_v52 }
 0x3ee   :  { %v1216_v63 = vcombine.low %v1208_v44, %v1209_v53  ;;  %v1217_v1 = vcombine.low %v1210_v54, %v1211_v55 }
 0x3f0   :  { %v1224_v2 = vrot.slane %v1216_v63, %v3430_v59  ;;  %v1231_v3 = vrot.slane %v1217_v1, %v3430_v59 }
 0x3f2   :  { %v1232_v4 = vcombine.low %v1224_v2, %v1231_v3 }
 0x3f4   :  { %v1239_v32 = vrot.slane %v1232_v4, %v3430_v59 }
 0x3f6   :  { %v1241_v5 = vsub.f32 %v1186_v30, %v1239_v32 }
 0x3f8   :  { %v1250_v62 = vrot.slane %v1241_v5, %v3422_v8  ;;  %v1254_v0 = vrot.slane %v1241_v5, %v3425_v10  ;;  %v1258_v50 = vrot.slane %v1241_v5, %v3473_v45  ;;  %v1262_v52 = vrot.slane %v1241_v5, %v3476_v46 }
 0x3fa   :  { %v1267_v6 = vadd.f32 %v1250_v62, %v1242_v56  ;;  %v1268_v9 = vadd.f32 %v1254_v0, %v1243_v58  ;;  %v1269_v57 = vadd.f32 %v1258_v50, %v1244_v60  ;;  %v1270_v11 = vadd.f32 %v1262_v52, %v1245_v61 }
 0x3fc   :  { %vm1271_vm4 = vcmp.gt.f32.partialorder %v1267_v6, 0.0  ;;  %vm1272_vm5 = vcmp.gt.f32.partialorder %v1268_v9, 0.0  ;;  %vm1273_vm6 = vcmp.gt.f32.partialorder %v1269_v57, 0.0  ;;  %vm1274_vm7 = vcmp.gt.f32.partialorder %v1270_v11, 0.0 }
 0x3fd   :  { %v1275_v12 = vmul.f32 0.2, %v1267_v6  ;;  %v1276_v13 = vmul.f32 0.2, %v1268_v9  ;;  %v1277_v15 = vmul.f32 0.2, %v1269_v57 }
 0x3fe   :  { %v1278_v17 = vmul.f32 0.2, %v1270_v11 }
 0x3ff   :  { %v1279_v18 = vsel %vm1271_vm4, %v1267_v6, %v1275_v12  ;;  %v1280_v19 = vsel %vm1272_vm5, %v1268_v9, %v1276_v13  ;;  %v1281_v20 = vsel %vm1273_vm6, %v1269_v57, %v1277_v15 }
 0x400   :  { %v1282_v21 = vsel %vm1274_vm7, %v1270_v11, %v1278_v17  ;;  %v3504_v22 = vpack.c.bf16 %v1279_v18, %v1279_v18  ;;  %v3506_v23 = vpack.c.bf16 %v1280_v19, %v1280_v19  ;;  %v3508_v24 = vpack.c.bf16 %v1281_v20, %v1281_v20 }
 0x401   :  { %v3510_v16 = vpack.c.bf16 %v1282_v21, %v1282_v21 }
 0x402   :  { %3177 = dma.done.wait [#allocation4], 32768 }
 0x403   :  { %3178 = vsyncadd [#allocation4], 4294934528  ;;  %1621 = vmatprep.mubr.bf16.mxu1 %v3506_v23  ;;  %1662 = vmatprep.mubr.bf16.mxu0 %v3510_v16  ;;  %v1292_v14 = vld [vmem:[#allocation2 + $0x8] sm:$0xff]  ;;  %v1291_v25 = vld [vmem:[#allocation2] sm:$0xff] }
 0x404   :  { %v1420_v26 = vld [vmem:[#allocation2 + $0x408] sm:$0xff]  ;;  %1589 = vmatprep.subr.bf16.mxu1 %v1292_v14  ;;  %v1419_v27 = vld [vmem:[#allocation2 + $0x400] sm:$0xff] }
 0x405   :  { %1630 = vmatprep.subr.bf16.mxu0 %v1420_v26  ;;  %v1300_v28 = vld [vmem:[#allocation2 + $0x48] sm:$0xff]  ;;  %1590 = vmatpush1.bf16.msra.mxu1 %v1291_v25  ;;  %v1299_v31 = vld [vmem:[#allocation2 + $0x40] sm:$0xff] }
 0x406   :  { %1631 = vmatpush1.bf16.msra.mxu0 %v1419_v27  ;;  %v1428_v29 = vld [vmem:[#allocation2 + $0x448] sm:$0xff]  ;;  %1591 = vmatprep.subr.bf16.mxu1 %v1300_v28  ;;  %v1427_v33 = vld [vmem:[#allocation2 + $0x440] sm:$0xff] }
 0x407   :  { %1632 = vmatprep.subr.bf16.mxu0 %v1428_v29  ;;  %v1308_v34 = vld [vmem:[#allocation2 + $0x88] sm:$0xff]  ;;  %v1307_v36 = vld [vmem:[#allocation2 + $0x80] sm:$0xff] }
 0x408   :  { %v1436_v35 = vld [vmem:[#allocation2 + $0x488] sm:$0xff]  ;;  %v1435_v37 = vld [vmem:[#allocation2 + $0x480] sm:$0xff] }
 0x409   :  { %1592 = vmatpush1.bf16.msra.mxu1 %v1299_v31  ;;  %v1316_v38 = vld [vmem:[#allocation2 + $0xc8] sm:$0xff]  ;;  %v1315_v40 = vld [vmem:[#allocation2 + $0xc0] sm:$0xff] }
 0x40a   :  { %1633 = vmatpush1.bf16.msra.mxu0 %v1427_v33  ;;  %1593 = vmatprep.subr.bf16.mxu1 %v1308_v34  ;;  %v1444_v39 = vld [vmem:[#allocation2 + $0x4c8] sm:$0xff]  ;;  %v1443_v41 = vld [vmem:[#allocation2 + $0x4c0] sm:$0xff] }
 0x40b   :  { %1634 = vmatprep.subr.bf16.mxu0 %v1436_v35  ;;  %v1324_v42 = vld [vmem:[#allocation2 + $0x108] sm:$0xff]  ;;  %v1323_v47 = vld [vmem:[#allocation2 + $0x100] sm:$0xff] }
 0x40c   :  { %v1452_v43 = vld [vmem:[#allocation2 + $0x508] sm:$0xff]  ;;  %v1451_v48 = vld [vmem:[#allocation2 + $0x500] sm:$0xff] }
 0x40d   :  { %1594 = vmatpush1.bf16.msra.mxu1 %v1307_v36  ;;  %v1332_v49 = vld [vmem:[#allocation2 + $0x148] sm:$0xff]  ;;  %v1331_v44 = vld [vmem:[#allocation2 + $0x140] sm:$0xff]  ;;  %v1294_v36 = vld [vmem:[#allocation2 + $0x18] sm:$0xff] }
 0x40e   :  { %1635 = vmatpush1.bf16.msra.mxu0 %v1435_v37  ;;  %1595 = vmatprep.subr.bf16.mxu1 %v1316_v38  ;;  %v1460_v51 = vld [vmem:[#allocation2 + $0x548] sm:$0xff]  ;;  %v1459_v53 = vld [vmem:[#allocation2 + $0x540] sm:$0xff]  ;;  %v1293_v38 = vld [vmem:[#allocation2 + $0x10] sm:$0xff] }
 0x40f   :  { %1636 = vmatprep.subr.bf16.mxu0 %v1444_v39  ;;  %v1340_v54 = vld [vmem:[#allocation2 + $0x188] sm:$0xff]  ;;  %v1339_v56 = vld [vmem:[#allocation2 + $0x180] sm:$0xff] }
 0x410   :  { %v1468_v55 = vld [vmem:[#allocation2 + $0x588] sm:$0xff]  ;;  %v1467_v58 = vld [vmem:[#allocation2 + $0x580] sm:$0xff] }
 0x411   :  { %1596 = vmatpush1.bf16.msra.mxu1 %v1315_v40  ;;  %v1348_v60 = vld [vmem:[#allocation2 + $0x1c8] sm:$0xff]  ;;  %v1347_v63 = vld [vmem:[#allocation2 + $0x1c0] sm:$0xff]  ;;  %v1302_v40 = vld [vmem:[#allocation2 + $0x58] sm:$0xff] }
 0x412   :  { %1637 = vmatpush1.bf16.msra.mxu0 %v1443_v41  ;;  %1597 = vmatprep.subr.bf16.mxu1 %v1324_v42  ;;  %v1476_v61 = vld [vmem:[#allocation2 + $0x5c8] sm:$0xff]  ;;  %v1475_v1 = vld [vmem:[#allocation2 + $0x5c0] sm:$0xff]  ;;  %v1301_v42 = vld [vmem:[#allocation2 + $0x50] sm:$0xff] }
 0x413   :  { %1638 = vmatprep.subr.bf16.mxu0 %v1452_v43  ;;  %v1356_v2 = vld [vmem:[#allocation2 + $0x208] sm:$0xff]  ;;  %v1355_v4 = vld [vmem:[#allocation2 + $0x200] sm:$0xff] }
 0x414   :  { %v1484_v3 = vld [vmem:[#allocation2 + $0x608] sm:$0xff]  ;;  %v1483_v30 = vld [vmem:[#allocation2 + $0x600] sm:$0xff] }
 0x415   :  { %1598 = vmatpush1.bf16.msra.mxu1 %v1323_v47  ;;  %v1364_v32 = vld [vmem:[#allocation2 + $0x248] sm:$0xff]  ;;  %v1363_v62 = vld [vmem:[#allocation2 + $0x240] sm:$0xff]  ;;  %v1310_v47 = vld [vmem:[#allocation2 + $0x98] sm:$0xff] }
 0x416   :  { %1639 = vmatpush1.bf16.msra.mxu0 %v1451_v48  ;;  %1599 = vmatprep.subr.bf16.mxu1 %v1332_v49  ;;  %v1492_v5 = vld [vmem:[#allocation2 + $0x648] sm:$0xff]  ;;  %v1491_v0 = vld [vmem:[#allocation2 + $0x640] sm:$0xff]  ;;  %v1309_v49 = vld [vmem:[#allocation2 + $0x90] sm:$0xff] }
 0x417   :  { %1640 = vmatprep.subr.bf16.mxu0 %v1460_v51  ;;  %v1372_v50 = vld [vmem:[#allocation2 + $0x288] sm:$0xff]  ;;  %v1371_v6 = vld [vmem:[#allocation2 + $0x280] sm:$0xff] }
 0x418   :  { %v1500_v52 = vld [vmem:[#allocation2 + $0x688] sm:$0xff]  ;;  %v1499_v9 = vld [vmem:[#allocation2 + $0x680] sm:$0xff] }
 0x419   :  { %1600 = vmatpush1.bf16.msra.mxu1 %v1331_v44  ;;  %v1380_v57 = vld [vmem:[#allocation2 + $0x2c8] sm:$0xff]  ;;  %v1379_v12 = vld [vmem:[#allocation2 + $0x2c0] sm:$0xff]  ;;  %v1318_v44 = vld [vmem:[#allocation2 + $0xd8] sm:$0xff] }
 0x41a   :  { %1641 = vmatpush1.bf16.msra.mxu0 %v1459_v53  ;;  %1601 = vmatprep.subr.bf16.mxu1 %v1340_v54  ;;  %v1508_v11 = vld [vmem:[#allocation2 + $0x6c8] sm:$0xff]  ;;  %v1507_v13 = vld [vmem:[#allocation2 + $0x6c0] sm:$0xff]  ;;  %v1317_v54 = vld [vmem:[#allocation2 + $0xd0] sm:$0xff] }
 0x41b   :  { %1642 = vmatprep.subr.bf16.mxu0 %v1468_v55  ;;  %v1388_v15 = vld [vmem:[#allocation2 + $0x308] sm:$0xff]  ;;  %v1387_v18 = vld [vmem:[#allocation2 + $0x300] sm:$0xff] }
 0x41c   :  { %v1516_v17 = vld [vmem:[#allocation2 + $0x708] sm:$0xff]  ;;  %v1515_v19 = vld [vmem:[#allocation2 + $0x700] sm:$0xff] }
 0x41d   :  { %1602 = vmatpush1.bf16.msra.mxu1 %v1339_v56  ;;  %v1396_v20 = vld [vmem:[#allocation2 + $0x348] sm:$0xff]  ;;  %v1395_v14 = vld [vmem:[#allocation2 + $0x340] sm:$0xff]  ;;  %v1326_v56 = vld [vmem:[#allocation2 + $0x118] sm:$0xff] }
 0x41e   :  { %1643 = vmatpush1.bf16.msra.mxu0 %v1467_v58  ;;  %1603 = vmatprep.subr.bf16.mxu1 %v1348_v60  ;;  %v1524_v21 = vld [vmem:[#allocation2 + $0x748] sm:$0xff]  ;;  %v1523_v25 = vld [vmem:[#allocation2 + $0x740] sm:$0xff]  ;;  %v1325_v60 = vld [vmem:[#allocation2 + $0x110] sm:$0xff] }
 0x41f   :  { %1644 = vmatprep.subr.bf16.mxu0 %v1476_v61  ;;  %v1404_v26 = vld [vmem:[#allocation2 + $0x388] sm:$0xff]  ;;  %v1403_v28 = vld [vmem:[#allocation2 + $0x380] sm:$0xff] }
 0x420   :  { %v1532_v27 = vld [vmem:[#allocation2 + $0x788] sm:$0xff]  ;;  %v1531_v29 = vld [vmem:[#allocation2 + $0x780] sm:$0xff] }
 0x421   :  { %1604 = vmatpush1.bf16.msra.mxu1 %v1347_v63  ;;  %v1412_v31 = vld [vmem:[#allocation2 + $0x3c8] sm:$0xff]  ;;  %v1411_v34 = vld [vmem:[#allocation2 + $0x3c0] sm:$0xff]  ;;  %v1334_v63 = vld [vmem:[#allocation2 + $0x158] sm:$0xff] }
 0x422   :  { %1645 = vmatpush1.bf16.msra.mxu0 %v1475_v1  ;;  %1605 = vmatprep.subr.bf16.mxu1 %v1356_v2  ;;  %v1540_v33 = vld [vmem:[#allocation2 + $0x7c8] sm:$0xff]  ;;  %v1539_v35 = vld [vmem:[#allocation2 + $0x7c0] sm:$0xff]  ;;  %v1333_v2 = vld [vmem:[#allocation2 + $0x150] sm:$0xff] }
 0x423   :  { %1646 = vmatprep.subr.bf16.mxu0 %v1484_v3  ;;  %v1296_v37 = vld [vmem:[#allocation2 + $0x28] sm:$0xff]  ;;  %v1295_v39 = vld [vmem:[#allocation2 + $0x20] sm:$0xff] }
 0x424   :  { %v1304_v41 = vld [vmem:[#allocation2 + $0x68] sm:$0xff]  ;;  %v1303_v43 = vld [vmem:[#allocation2 + $0x60] sm:$0xff] }
 0x425   :  { %1606 = vmatpush1.bf16.msra.mxu1 %v1355_v4  ;;  %v1312_v48 = vld [vmem:[#allocation2 + $0xa8] sm:$0xff]  ;;  %v1311_v51 = vld [vmem:[#allocation2 + $0xa0] sm:$0xff]  ;;  %v1342_v4 = vld [vmem:[#allocation2 + $0x198] sm:$0xff] }
 0x426   :  { %1647 = vmatpush1.bf16.msra.mxu0 %v1483_v30  ;;  %1607 = vmatprep.subr.bf16.mxu1 %v1364_v32  ;;  %v1320_v53 = vld [vmem:[#allocation2 + $0xe8] sm:$0xff]  ;;  %v1319_v55 = vld [vmem:[#allocation2 + $0xe0] sm:$0xff]  ;;  %v1341_v32 = vld [vmem:[#allocation2 + $0x190] sm:$0xff] }
 0x427   :  { %1648 = vmatprep.subr.bf16.mxu0 %v1492_v5  ;;  %v1328_v58 = vld [vmem:[#allocation2 + $0x128] sm:$0xff]  ;;  %v1327_v61 = vld [vmem:[#allocation2 + $0x120] sm:$0xff] }
 0x428   :  { %v1336_v1 = vld [vmem:[#allocation2 + $0x168] sm:$0xff]  ;;  %v1335_v3 = vld [vmem:[#allocation2 + $0x160] sm:$0xff] }
 0x429   :  { %1608 = vmatpush1.bf16.msra.mxu1 %v1363_v62  ;;  %v1344_v30 = vld [vmem:[#allocation2 + $0x1a8] sm:$0xff]  ;;  %v1343_v5 = vld [vmem:[#allocation2 + $0x1a0] sm:$0xff]  ;;  %v1350_v62 = vld [vmem:[#allocation2 + $0x1d8] sm:$0xff] }
 0x42a   :  { %1649 = vmatpush1.bf16.msra.mxu0 %v1491_v0  ;;  %1609 = vmatprep.subr.bf16.mxu1 %v1372_v50  ;;  %v1352_v0 = vld [vmem:[#allocation2 + $0x1e8] sm:$0xff]  ;;  %v1349_v50 = vld [vmem:[#allocation2 + $0x1d0] sm:$0xff] }
 0x42b   :  { %1650 = vmatprep.subr.bf16.mxu0 %v1500_v52  ;;  %v1351_v52 = vld [vmem:[#allocation2 + $0x1e0] sm:$0xff] }
 0x42d   :  { %1610 = vmatpush1.bf16.msra.mxu1 %v1371_v6  ;;  %v1358_v6 = vld [vmem:[#allocation2 + $0x218] sm:$0xff] }
 0x42e   :  { %1651 = vmatpush1.bf16.msra.mxu0 %v1499_v9  ;;  %1611 = vmatprep.subr.bf16.mxu1 %v1380_v57  ;;  %v1360_v9 = vld [vmem:[#allocation2 + $0x228] sm:$0xff]  ;;  %v1357_v57 = vld [vmem:[#allocation2 + $0x210] sm:$0xff] }
 0x42f   :  { %1652 = vmatprep.subr.bf16.mxu0 %v1508_v11  ;;  %v1359_v11 = vld [vmem:[#allocation2 + $0x220] sm:$0xff] }
 0x431   :  { %1612 = vmatpush1.bf16.msra.mxu1 %v1379_v12  ;;  %v1366_v12 = vld [vmem:[#allocation2 + $0x258] sm:$0xff] }
 0x432   :  { %1653 = vmatpush1.bf16.msra.mxu0 %v1507_v13  ;;  %1613 = vmatprep.subr.bf16.mxu1 %v1388_v15  ;;  %v1368_v13 = vld [vmem:[#allocation2 + $0x268] sm:$0xff]  ;;  %v1365_v15 = vld [vmem:[#allocation2 + $0x250] sm:$0xff] }
 0x433   :  { %1654 = vmatprep.subr.bf16.mxu0 %v1516_v17  ;;  %v1367_v17 = vld [vmem:[#allocation2 + $0x260] sm:$0xff] }
 0x435   :  { %1614 = vmatpush1.bf16.msra.mxu1 %v1387_v18  ;;  %v1374_v18 = vld [vmem:[#allocation2 + $0x298] sm:$0xff] }
 0x436   :  { %1655 = vmatpush1.bf16.msra.mxu0 %v1515_v19  ;;  %1615 = vmatprep.subr.bf16.mxu1 %v1396_v20  ;;  %v1376_v19 = vld [vmem:[#allocation2 + $0x2a8] sm:$0xff]  ;;  %v1373_v20 = vld [vmem:[#allocation2 + $0x290] sm:$0xff] }
 0x437   :  { %1656 = vmatprep.subr.bf16.mxu0 %v1524_v21  ;;  %v1375_v21 = vld [vmem:[#allocation2 + $0x2a0] sm:$0xff] }
 0x439   :  { %1616 = vmatpush1.bf16.msra.mxu1 %v1395_v14  ;;  %v1382_v14 = vld [vmem:[#allocation2 + $0x2d8] sm:$0xff] }
 0x43a   :  { %1657 = vmatpush1.bf16.msra.mxu0 %v1523_v25  ;;  %1617 = vmatprep.subr.bf16.mxu1 %v1404_v26  ;;  %v1384_v25 = vld [vmem:[#allocation2 + $0x2e8] sm:$0xff]  ;;  %v1381_v26 = vld [vmem:[#allocation2 + $0x2d0] sm:$0xff] }
 0x43b   :  { %1658 = vmatprep.subr.bf16.mxu0 %v1532_v27  ;;  %v1383_v27 = vld [vmem:[#allocation2 + $0x2e0] sm:$0xff] }
 0x43d   :  { %1618 = vmatpush1.bf16.msra.mxu1 %v1403_v28  ;;  %v1390_v28 = vld [vmem:[#allocation2 + $0x318] sm:$0xff] }
 0x43e   :  { %1659 = vmatpush1.bf16.msra.mxu0 %v1531_v29  ;;  %1619 = vmatprep.subr.bf16.mxu1 %v1412_v31  ;;  %v1392_v29 = vld [vmem:[#allocation2 + $0x328] sm:$0xff]  ;;  %v1389_v31 = vld [vmem:[#allocation2 + $0x310] sm:$0xff] }
 0x43f   :  { %1660 = vmatprep.subr.bf16.mxu0 %v1540_v33  ;;  %v1391_v33 = vld [vmem:[#allocation2 + $0x320] sm:$0xff] }
 0x441   :  { %1620 = vmatpush1.bf16.msra.mxu1 %v1411_v34  ;;  %v1398_v34 = vld [vmem:[#allocation2 + $0x358] sm:$0xff] }
 0x442   :  { %1661 = vmatpush1.bf16.msra.mxu0 %v1539_v35  ;;  %1671 = vmatprep.subr.bf16.mxu1 %v1294_v36  ;;  %v1400_v35 = vld [vmem:[#allocation2 + $0x368] sm:$0xff]  ;;  %v1397_v36 = vld [vmem:[#allocation2 + $0x350] sm:$0xff] }
 0x443   :  { %1753 = vmatprep.subr.bf16.mxu0 %v1296_v37  ;;  %v1399_v37 = vld [vmem:[#allocation2 + $0x360] sm:$0xff] }
 0x444   :  { %1622 = vmatmul.mubr.bf16.vlgmr.msra.gmra.mrb[12].mxu1 %v3504_v22 }
 0x445   :  { %1663 = vmatmul.mubr.bf16.vlgmr.msra.gmra.mrb[4].mxu0 %v3508_v24  ;;  %1672 = vmatpush1.bf16.msra.mxu1 %v1293_v38  ;;  %v1406_v38 = vld [vmem:[#allocation2 + $0x398] sm:$0xff] }
 0x446   :  { %1754 = vmatpush1.bf16.msra.mxu0 %v1295_v39  ;;  %1673 = vmatprep.subr.bf16.mxu1 %v1302_v40  ;;  %v1408_v39 = vld [vmem:[#allocation2 + $0x3a8] sm:$0xff]  ;;  %v1405_v40 = vld [vmem:[#allocation2 + $0x390] sm:$0xff] }
 0x447   :  { %1755 = vmatprep.subr.bf16.mxu0 %v1304_v41  ;;  %1703 = vmatprep.mubr.bf16.mxu1 %v3506_v23  ;;  %v1407_v41 = vld [vmem:[#allocation2 + $0x3a0] sm:$0xff] }
 0x448   :  { %1785 = vmatprep.mubr.bf16.mxu0 %v3506_v23 }
 0x449   :  { %1674 = vmatpush1.bf16.msra.mxu1 %v1301_v42  ;;  %v1414_v42 = vld [vmem:[#allocation2 + $0x3d8] sm:$0xff] }
 0x44a   :  { %1756 = vmatpush1.bf16.msra.mxu0 %v1303_v43  ;;  %1675 = vmatprep.subr.bf16.mxu1 %v1310_v47  ;;  %v1416_v43 = vld [vmem:[#allocation2 + $0x3e8] sm:$0xff]  ;;  %v1413_v47 = vld [vmem:[#allocation2 + $0x3d0] sm:$0xff] }
 0x44b   :  { %1757 = vmatprep.subr.bf16.mxu0 %v1312_v48  ;;  %v1415_v48 = vld [vmem:[#allocation2 + $0x3e0] sm:$0xff] }
 0x44d   :  { %1676 = vmatpush1.bf16.msra.mxu1 %v1309_v49  ;;  %v1422_v49 = vld [vmem:[#allocation2 + $0x418] sm:$0xff] }
 0x44e   :  { %1758 = vmatpush1.bf16.msra.mxu0 %v1311_v51  ;;  %1677 = vmatprep.subr.bf16.mxu1 %v1318_v44  ;;  %v1424_v51 = vld [vmem:[#allocation2 + $0x428] sm:$0xff]  ;;  %v1421_v44 = vld [vmem:[#allocation2 + $0x410] sm:$0xff] }
 0x44f   :  { %1759 = vmatprep.subr.bf16.mxu0 %v1320_v53  ;;  %v1423_v53 = vld [vmem:[#allocation2 + $0x420] sm:$0xff] }
 0x451   :  { %1678 = vmatpush1.bf16.msra.mxu1 %v1317_v54  ;;  %v1430_v54 = vld [vmem:[#allocation2 + $0x458] sm:$0xff] }
 0x452   :  { %1760 = vmatpush1.bf16.msra.mxu0 %v1319_v55  ;;  %1679 = vmatprep.subr.bf16.mxu1 %v1326_v56  ;;  %v1432_v55 = vld [vmem:[#allocation2 + $0x468] sm:$0xff]  ;;  %v1429_v56 = vld [vmem:[#allocation2 + $0x450] sm:$0xff] }
 0x453   :  { %1761 = vmatprep.subr.bf16.mxu0 %v1328_v58  ;;  %v1431_v58 = vld [vmem:[#allocation2 + $0x460] sm:$0xff] }
 0x455   :  { %1680 = vmatpush1.bf16.msra.mxu1 %v1325_v60  ;;  %v1438_v60 = vld [vmem:[#allocation2 + $0x498] sm:$0xff] }
 0x456   :  { %1762 = vmatpush1.bf16.msra.mxu0 %v1327_v61  ;;  %1681 = vmatprep.subr.bf16.mxu1 %v1334_v63  ;;  %v1440_v61 = vld [vmem:[#allocation2 + $0x4a8] sm:$0xff]  ;;  %v1437_v63 = vld [vmem:[#allocation2 + $0x490] sm:$0xff] }
 0x457   :  { %1763 = vmatprep.subr.bf16.mxu0 %v1336_v1  ;;  %v1439_v1 = vld [vmem:[#allocation2 + $0x4a0] sm:$0xff] }
 0x459   :  { %1682 = vmatpush1.bf16.msra.mxu1 %v1333_v2  ;;  %v1446_v2 = vld [vmem:[#allocation2 + $0x4d8] sm:$0xff] }
 0x45a   :  { %1764 = vmatpush1.bf16.msra.mxu0 %v1335_v3  ;;  %1683 = vmatprep.subr.bf16.mxu1 %v1342_v4  ;;  %v1448_v3 = vld [vmem:[#allocation2 + $0x4e8] sm:$0xff]  ;;  %v1445_v4 = vld [vmem:[#allocation2 + $0x4d0] sm:$0xff] }
 0x45b   :  { %1765 = vmatprep.subr.bf16.mxu0 %v1344_v30  ;;  %v1447_v30 = vld [vmem:[#allocation2 + $0x4e0] sm:$0xff] }
 0x45d   :  { %1684 = vmatpush1.bf16.msra.mxu1 %v1341_v32  ;;  %v1454_v32 = vld [vmem:[#allocation2 + $0x518] sm:$0xff] }
 0x45e   :  { %1766 = vmatpush1.bf16.msra.mxu0 %v1343_v5  ;;  %1685 = vmatprep.subr.bf16.mxu1 %v1350_v62  ;;  %v1456_v5 = vld [vmem:[#allocation2 + $0x528] sm:$0xff]  ;;  %v1453_v62 = vld [vmem:[#allocation2 + $0x510] sm:$0xff] }
 0x45f   :  { %1767 = vmatprep.subr.bf16.mxu0 %v1352_v0  ;;  %v1455_v0 = vld [vmem:[#allocation2 + $0x520] sm:$0xff] }
 0x461   :  { %1686 = vmatpush1.bf16.msra.mxu1 %v1349_v50  ;;  %v1462_v50 = vld [vmem:[#allocation2 + $0x558] sm:$0xff] }
 0x462   :  { %1768 = vmatpush1.bf16.msra.mxu0 %v1351_v52  ;;  %1687 = vmatprep.subr.bf16.mxu1 %v1358_v6  ;;  %v1464_v52 = vld [vmem:[#allocation2 + $0x568] sm:$0xff]  ;;  %v1461_v6 = vld [vmem:[#allocation2 + $0x550] sm:$0xff] }
 0x463   :  { %1769 = vmatprep.subr.bf16.mxu0 %v1360_v9  ;;  %v1463_v9 = vld [vmem:[#allocation2 + $0x560] sm:$0xff] }
 0x465   :  { %1688 = vmatpush1.bf16.msra.mxu1 %v1357_v57  ;;  %v1470_v57 = vld [vmem:[#allocation2 + $0x598] sm:$0xff] }
 0x466   :  { %1770 = vmatpush1.bf16.msra.mxu0 %v1359_v11  ;;  %1689 = vmatprep.subr.bf16.mxu1 %v1366_v12  ;;  %v1472_v11 = vld [vmem:[#allocation2 + $0x5a8] sm:$0xff]  ;;  %v1469_v12 = vld [vmem:[#allocation2 + $0x590] sm:$0xff] }
 0x467   :  { %1771 = vmatprep.subr.bf16.mxu0 %v1368_v13  ;;  %v1471_v13 = vld [vmem:[#allocation2 + $0x5a0] sm:$0xff] }
 0x469   :  { %1690 = vmatpush1.bf16.msra.mxu1 %v1365_v15  ;;  %v1478_v15 = vld [vmem:[#allocation2 + $0x5d8] sm:$0xff] }
 0x46a   :  { %1772 = vmatpush1.bf16.msra.mxu0 %v1367_v17  ;;  %1691 = vmatprep.subr.bf16.mxu1 %v1374_v18  ;;  %v1480_v17 = vld [vmem:[#allocation2 + $0x5e8] sm:$0xff]  ;;  %v1477_v18 = vld [vmem:[#allocation2 + $0x5d0] sm:$0xff] }
 0x46b   :  { %1773 = vmatprep.subr.bf16.mxu0 %v1376_v19  ;;  %v1479_v19 = vld [vmem:[#allocation2 + $0x5e0] sm:$0xff] }
 0x46d   :  { %1692 = vmatpush1.bf16.msra.mxu1 %v1373_v20  ;;  %v1486_v20 = vld [vmem:[#allocation2 + $0x618] sm:$0xff] }
 0x46e   :  { %1774 = vmatpush1.bf16.msra.mxu0 %v1375_v21  ;;  %1693 = vmatprep.subr.bf16.mxu1 %v1382_v14  ;;  %v1488_v21 = vld [vmem:[#allocation2 + $0x628] sm:$0xff]  ;;  %v1485_v14 = vld [vmem:[#allocation2 + $0x610] sm:$0xff] }
 0x46f   :  { %1775 = vmatprep.subr.bf16.mxu0 %v1384_v25  ;;  %v1487_v25 = vld [vmem:[#allocation2 + $0x620] sm:$0xff] }
 0x471   :  { %1694 = vmatpush1.bf16.msra.mxu1 %v1381_v26  ;;  %v1494_v26 = vld [vmem:[#allocation2 + $0x658] sm:$0xff] }
 0x472   :  { %1776 = vmatpush1.bf16.msra.mxu0 %v1383_v27  ;;  %1695 = vmatprep.subr.bf16.mxu1 %v1390_v28  ;;  %v1496_v27 = vld [vmem:[#allocation2 + $0x668] sm:$0xff]  ;;  %v1493_v28 = vld [vmem:[#allocation2 + $0x650] sm:$0xff] }
 0x473   :  { %1777 = vmatprep.subr.bf16.mxu0 %v1392_v29  ;;  %v1495_v29 = vld [vmem:[#allocation2 + $0x660] sm:$0xff] }
 0x475   :  { %1696 = vmatpush1.bf16.msra.mxu1 %v1389_v31  ;;  %v1502_v31 = vld [vmem:[#allocation2 + $0x698] sm:$0xff] }
 0x476   :  { %1778 = vmatpush1.bf16.msra.mxu0 %v1391_v33  ;;  %1697 = vmatprep.subr.bf16.mxu1 %v1398_v34  ;;  %v1504_v33 = vld [vmem:[#allocation2 + $0x6a8] sm:$0xff]  ;;  %v1501_v34 = vld [vmem:[#allocation2 + $0x690] sm:$0xff] }
 0x477   :  { %1779 = vmatprep.subr.bf16.mxu0 %v1400_v35  ;;  %v1503_v35 = vld [vmem:[#allocation2 + $0x6a0] sm:$0xff] }
 0x479   :  { %1698 = vmatpush1.bf16.msra.mxu1 %v1397_v36  ;;  %v1510_v36 = vld [vmem:[#allocation2 + $0x6d8] sm:$0xff] }
 0x47a   :  { %1780 = vmatpush1.bf16.msra.mxu0 %v1399_v37  ;;  %1699 = vmatprep.subr.bf16.mxu1 %v1406_v38  ;;  %v1512_v37 = vld [vmem:[#allocation2 + $0x6e8] sm:$0xff]  ;;  %v1509_v38 = vld [vmem:[#allocation2 + $0x6d0] sm:$0xff] }
 0x47b   :  { %1781 = vmatprep.subr.bf16.mxu0 %v1408_v39  ;;  %v1511_v39 = vld [vmem:[#allocation2 + $0x6e0] sm:$0xff] }
 0x47d   :  { %1700 = vmatpush1.bf16.msra.mxu1 %v1405_v40  ;;  %v1518_v40 = vld [vmem:[#allocation2 + $0x718] sm:$0xff] }
 0x47e   :  { %1782 = vmatpush1.bf16.msra.mxu0 %v1407_v41  ;;  %1701 = vmatprep.subr.bf16.mxu1 %v1414_v42  ;;  %v1520_v41 = vld [vmem:[#allocation2 + $0x728] sm:$0xff]  ;;  %v1517_v42 = vld [vmem:[#allocation2 + $0x710] sm:$0xff] }
 0x47f   :  { %1783 = vmatprep.subr.bf16.mxu0 %v1416_v43  ;;  %v1519_v43 = vld [vmem:[#allocation2 + $0x720] sm:$0xff] }
 0x481   :  { %1702 = vmatpush1.bf16.msra.mxu1 %v1413_v47  ;;  %v1526_v47 = vld [vmem:[#allocation2 + $0x758] sm:$0xff] }
 0x482   :  { %1784 = vmatpush1.bf16.msra.mxu0 %v1415_v48  ;;  %1712 = vmatprep.subr.bf16.mxu1 %v1422_v49  ;;  %v1528_v48 = vld [vmem:[#allocation2 + $0x768] sm:$0xff]  ;;  %v1525_v49 = vld [vmem:[#allocation2 + $0x750] sm:$0xff] }
 0x483   :  { %1794 = vmatprep.subr.bf16.mxu0 %v1424_v51  ;;  %v1527_v51 = vld [vmem:[#allocation2 + $0x760] sm:$0xff] }
 0x484   :  { %1704 = vmatmul.mubr.bf16.vlgmr.msra.gmra.mrb[16].mxu1 %v3504_v22 }
 0x485   :  { %1786 = vmatmul.mubr.bf16.vlgmr.msra.gmra.mrb[8].mxu0 %v3504_v22  ;;  %1713 = vmatpush1.bf16.msra.mxu1 %v1421_v44  ;;  %v1534_v44 = vld [vmem:[#allocation2 + $0x798] sm:$0xff] }
 0x486   :  { %1795 = vmatpush1.bf16.msra.mxu0 %v1423_v53  ;;  %1714 = vmatprep.subr.bf16.mxu1 %v1430_v54  ;;  %v1536_v53 = vld [vmem:[#allocation2 + $0x7a8] sm:$0xff]  ;;  %v1533_v54 = vld [vmem:[#allocation2 + $0x790] sm:$0xff] }
 0x487   :  { %1796 = vmatprep.subr.bf16.mxu0 %v1432_v55  ;;  %1744 = vmatprep.mubr.bf16.mxu1 %v3510_v16  ;;  %v1535_v55 = vld [vmem:[#allocation2 + $0x7a0] sm:$0xff] }
 0x488   :  { %1826 = vmatprep.mubr.bf16.mxu0 %v3510_v16 }
 0x489   :  { %1715 = vmatpush1.bf16.msra.mxu1 %v1429_v56  ;;  %v1542_v56 = vld [vmem:[#allocation2 + $0x7d8] sm:$0xff] }
 0x48a   :  { %1797 = vmatpush1.bf16.msra.mxu0 %v1431_v58  ;;  %1716 = vmatprep.subr.bf16.mxu1 %v1438_v60  ;;  %v1544_v58 = vld [vmem:[#allocation2 + $0x7e8] sm:$0xff]  ;;  %v1541_v60 = vld [vmem:[#allocation2 + $0x7d0] sm:$0xff] }
 0x48b   :  { %1798 = vmatprep.subr.bf16.mxu0 %v1440_v61  ;;  %v1543_v61 = vld [vmem:[#allocation2 + $0x7e0] sm:$0xff] }
 0x48d   :  { %1717 = vmatpush1.bf16.msra.mxu1 %v1437_v63  ;;  %v1298_v63 = vld [vmem:[#allocation2 + $0x38] sm:$0xff] }
 0x48e   :  { %1799 = vmatpush1.bf16.msra.mxu0 %v1439_v1  ;;  %1718 = vmatprep.subr.bf16.mxu1 %v1446_v2  ;;  %v1297_v1 = vld [vmem:[#allocation2 + $0x30] sm:$0xff]  ;;  %v1306_v2 = vld [vmem:[#allocation2 + $0x78] sm:$0xff] }
 0x48f   :  { %1800 = vmatprep.subr.bf16.mxu0 %v1448_v3  ;;  %v1305_v3 = vld [vmem:[#allocation2 + $0x70] sm:$0xff] }
 0x491   :  { %1719 = vmatpush1.bf16.msra.mxu1 %v1445_v4  ;;  %v1314_v4 = vld [vmem:[#allocation2 + $0xb8] sm:$0xff] }
 0x492   :  { %1801 = vmatpush1.bf16.msra.mxu0 %v1447_v30  ;;  %1720 = vmatprep.subr.bf16.mxu1 %v1454_v32  ;;  %v1313_v30 = vld [vmem:[#allocation2 + $0xb0] sm:$0xff]  ;;  %v1322_v32 = vld [vmem:[#allocation2 + $0xf8] sm:$0xff] }
 0x493   :  { %1802 = vmatprep.subr.bf16.mxu0 %v1456_v5  ;;  %v1321_v5 = vld [vmem:[#allocation2 + $0xf0] sm:$0xff] }
 0x495   :  { %1721 = vmatpush1.bf16.msra.mxu1 %v1453_v62  ;;  %v1330_v62 = vld [vmem:[#allocation2 + $0x138] sm:$0xff] }
 0x496   :  { %1803 = vmatpush1.bf16.msra.mxu0 %v1455_v0  ;;  %1722 = vmatprep.subr.bf16.mxu1 %v1462_v50  ;;  %v1329_v0 = vld [vmem:[#allocation2 + $0x130] sm:$0xff]  ;;  %v1338_v50 = vld [vmem:[#allocation2 + $0x178] sm:$0xff] }
 0x497   :  { %1804 = vmatprep.subr.bf16.mxu0 %v1464_v52  ;;  %v1337_v52 = vld [vmem:[#allocation2 + $0x170] sm:$0xff] }
 0x499   :  { %1723 = vmatpush1.bf16.msra.mxu1 %v1461_v6  ;;  %v1346_v6 = vld [vmem:[#allocation2 + $0x1b8] sm:$0xff] }
 0x49a   :  { %1805 = vmatpush1.bf16.msra.mxu0 %v1463_v9  ;;  %1724 = vmatprep.subr.bf16.mxu1 %v1470_v57  ;;  %v1354_v9 = vld [vmem:[#allocation2 + $0x1f8] sm:$0xff]  ;;  %v1353_v57 = vld [vmem:[#allocation2 + $0x1f0] sm:$0xff] }
 0x49b   :  { %1806 = vmatprep.subr.bf16.mxu0 %v1472_v11  ;;  %v1362_v11 = vld [vmem:[#allocation2 + $0x238] sm:$0xff] }
 0x49d   :  { %1725 = vmatpush1.bf16.msra.mxu1 %v1469_v12  ;;  %v1361_v12 = vld [vmem:[#allocation2 + $0x230] sm:$0xff] }
 0x49e   :  { %1807 = vmatpush1.bf16.msra.mxu0 %v1471_v13  ;;  %1726 = vmatprep.subr.bf16.mxu1 %v1478_v15  ;;  %v1370_v13 = vld [vmem:[#allocation2 + $0x278] sm:$0xff]  ;;  %v1369_v15 = vld [vmem:[#allocation2 + $0x270] sm:$0xff] }
 0x49f   :  { %1808 = vmatprep.subr.bf16.mxu0 %v1480_v17  ;;  %v1378_v17 = vld [vmem:[#allocation2 + $0x2b8] sm:$0xff] }
 0x4a1   :  { %1727 = vmatpush1.bf16.msra.mxu1 %v1477_v18  ;;  %v1377_v18 = vld [vmem:[#allocation2 + $0x2b0] sm:$0xff] }
 0x4a2   :  { %1809 = vmatpush1.bf16.msra.mxu0 %v1479_v19  ;;  %1728 = vmatprep.subr.bf16.mxu1 %v1486_v20  ;;  %v1386_v19 = vld [vmem:[#allocation2 + $0x2f8] sm:$0xff]  ;;  %v1385_v20 = vld [vmem:[#allocation2 + $0x2f0] sm:$0xff] }
 0x4a3   :  { %1810 = vmatprep.subr.bf16.mxu0 %v1488_v21  ;;  %v1394_v21 = vld [vmem:[#allocation2 + $0x338] sm:$0xff] }
 0x4a5   :  { %1729 = vmatpush1.bf16.msra.mxu1 %v1485_v14  ;;  %v1393_v14 = vld [vmem:[#allocation2 + $0x330] sm:$0xff] }
 0x4a6   :  { %1811 = vmatpush1.bf16.msra.mxu0 %v1487_v25  ;;  %1730 = vmatprep.subr.bf16.mxu1 %v1494_v26  ;;  %v1402_v25 = vld [vmem:[#allocation2 + $0x378] sm:$0xff]  ;;  %v1401_v26 = vld [vmem:[#allocation2 + $0x370] sm:$0xff] }
 0x4a7   :  { %1812 = vmatprep.subr.bf16.mxu0 %v1496_v27  ;;  %v1410_v27 = vld [vmem:[#allocation2 + $0x3b8] sm:$0xff] }
 0x4a9   :  { %1731 = vmatpush1.bf16.msra.mxu1 %v1493_v28  ;;  %v1409_v28 = vld [vmem:[#allocation2 + $0x3b0] sm:$0xff] }
 0x4aa   :  { %1813 = vmatpush1.bf16.msra.mxu0 %v1495_v29  ;;  %1732 = vmatprep.subr.bf16.mxu1 %v1502_v31  ;;  %v1418_v29 = vld [vmem:[#allocation2 + $0x3f8] sm:$0xff]  ;;  %v1417_v31 = vld [vmem:[#allocation2 + $0x3f0] sm:$0xff] }
 0x4ab   :  { %1814 = vmatprep.subr.bf16.mxu0 %v1504_v33  ;;  %v1426_v33 = vld [vmem:[#allocation2 + $0x438] sm:$0xff] }
 0x4ad   :  { %1733 = vmatpush1.bf16.msra.mxu1 %v1501_v34  ;;  %v1425_v34 = vld [vmem:[#allocation2 + $0x430] sm:$0xff] }
 0x4ae   :  { %1815 = vmatpush1.bf16.msra.mxu0 %v1503_v35  ;;  %1734 = vmatprep.subr.bf16.mxu1 %v1510_v36  ;;  %v1434_v35 = vld [vmem:[#allocation2 + $0x478] sm:$0xff]  ;;  %v1433_v36 = vld [vmem:[#allocation2 + $0x470] sm:$0xff] }
 0x4af   :  { %1816 = vmatprep.subr.bf16.mxu0 %v1512_v37  ;;  %v1442_v37 = vld [vmem:[#allocation2 + $0x4b8] sm:$0xff] }
 0x4b1   :  { %1735 = vmatpush1.bf16.msra.mxu1 %v1509_v38  ;;  %v1441_v38 = vld [vmem:[#allocation2 + $0x4b0] sm:$0xff] }
 0x4b2   :  { %1817 = vmatpush1.bf16.msra.mxu0 %v1511_v39  ;;  %1736 = vmatprep.subr.bf16.mxu1 %v1518_v40  ;;  %v1450_v39 = vld [vmem:[#allocation2 + $0x4f8] sm:$0xff]  ;;  %v1449_v40 = vld [vmem:[#allocation2 + $0x4f0] sm:$0xff] }
 0x4b3   :  { %1818 = vmatprep.subr.bf16.mxu0 %v1520_v41  ;;  %v1458_v41 = vld [vmem:[#allocation2 + $0x538] sm:$0xff] }
 0x4b5   :  { %1737 = vmatpush1.bf16.msra.mxu1 %v1517_v42  ;;  %v3530_v42 = vld [vmem:[%s3764_s12] sm:$0xff] }
 0x4b6   :  { %1819 = vmatpush1.bf16.msra.mxu0 %v1519_v43  ;;  %1738 = vmatprep.subr.bf16.mxu1 %v1526_v47  ;;  %v1552_v43 = vrot.slane %v3530_v42, %v3422_v8  ;;  %v1556_v47 = vrot.slane %v3530_v42, %v3425_v10 }
 0x4b7   :  { %1820 = vmatprep.subr.bf16.mxu0 %v1528_v48  ;;  %v1465_v48 = vld [vmem:[#allocation2 + $0x570] sm:$0xff] }
 0x4b9   :  { %1739 = vmatpush1.bf16.msra.mxu1 %v1525_v49 }
 0x4ba   :  { %1821 = vmatpush1.bf16.msra.mxu0 %v1527_v51  ;;  %1740 = vmatprep.subr.bf16.mxu1 %v1534_v44  ;;  %v1474_v44 = vld [vmem:[#allocation2 + $0x5b8] sm:$0xff] }
 0x4bb   :  { %1822 = vmatprep.subr.bf16.mxu0 %v1536_v53 }
 0x4bd   :  { %1741 = vmatpush1.bf16.msra.mxu1 %v1533_v54 }
 0x4be   :  { %1823 = vmatpush1.bf16.msra.mxu0 %v1535_v55  ;;  %1742 = vmatprep.subr.bf16.mxu1 %v1542_v56 }
 0x4bf   :  { %1824 = vmatprep.subr.bf16.mxu0 %v1544_v58 }
 0x4c1   :  { %1743 = vmatpush1.bf16.msra.mxu1 %v1541_v60 }
 0x4c2   :  { %1825 = vmatpush1.bf16.msra.mxu0 %v1543_v61  ;;  %1835 = vmatprep.subr.bf16.mxu1 %v1298_v63 }
 0x4c4   :  { %1745 = vmatmul.mubr.bf16.vlgmr.msra.gmra.mrb[16].mxu1 %v3508_v24 }
 0x4c5   :  { %1827 = vmatmul.mubr.bf16.vlgmr.msra.gmra.mrb[8].mxu0 %v3508_v24  ;;  %1836 = vmatpush1.bf16.msra.mxu1 %v1297_v1  ;;  %v1473_v1 = vld [vmem:[#allocation2 + $0x5b0] sm:$0xff] }
 0x4c6   :  { %1867 = vmatprep.mubr.bf16.mxu1 %v3506_v23  ;;  %1837 = vmatprep.subr.bf16.mxu1 %v1306_v2  ;;  %v1345_v23 = vld [vmem:[#allocation2 + $0x1b0] sm:$0xff] }
 0x4c9   :  { %1838 = vmatpush1.bf16.msra.mxu1 %v1305_v3 }
 0x4ca   :  { %1839 = vmatprep.subr.bf16.mxu1 %v1314_v4  ;;  %v1482_v4 = vld [vmem:[#allocation2 + $0x5f8] sm:$0xff] }
 0x4cd   :  { %1840 = vmatpush1.bf16.msra.mxu1 %v1313_v30 }
 0x4ce   :  { %1841 = vmatprep.subr.bf16.mxu1 %v1322_v32 }
 0x4d1   :  { %1842 = vmatpush1.bf16.msra.mxu1 %v1321_v5 }
 0x4d2   :  { %1843 = vmatprep.subr.bf16.mxu1 %v1330_v62 }
 0x4d5   :  { %1844 = vmatpush1.bf16.msra.mxu1 %v1329_v0 }
 0x4d6   :  { %1845 = vmatprep.subr.bf16.mxu1 %v1338_v50 }
 0x4d9   :  { %1846 = vmatpush1.bf16.msra.mxu1 %v1337_v52  ;;  %v1481_v52 = vld [vmem:[#allocation2 + $0x5f0] sm:$0xff] }
 0x4da   :  { %1847 = vmatprep.subr.bf16.mxu1 %v1346_v6 }
 0x4dd   :  { %1848 = vmatpush1.bf16.msra.mxu1 %v1345_v23 }
 0x4de   :  { %1849 = vmatprep.subr.bf16.mxu1 %v1354_v9  ;;  %v1490_v9 = vld [vmem:[#allocation2 + $0x638] sm:$0xff] }
 0x4e1   :  { %1850 = vmatpush1.bf16.msra.mxu1 %v1353_v57 }
 0x4e2   :  { %1851 = vmatprep.subr.bf16.mxu1 %v1362_v11 }
 0x4e5   :  { %1852 = vmatpush1.bf16.msra.mxu1 %v1361_v12 }
 0x4e6   :  { %1853 = vmatprep.subr.bf16.mxu1 %v1370_v13 }
 0x4e9   :  { %1854 = vmatpush1.bf16.msra.mxu1 %v1369_v15 }
 0x4ea   :  { %1855 = vmatprep.subr.bf16.mxu1 %v1378_v17 }
 0x4ed   :  { %1856 = vmatpush1.bf16.msra.mxu1 %v1377_v18  ;;  %v1489_v18 = vld [vmem:[#allocation2 + $0x630] sm:$0xff] }
 0x4ee   :  { %1857 = vmatprep.subr.bf16.mxu1 %v1386_v19 }
 0x4f1   :  { %1858 = vmatpush1.bf16.msra.mxu1 %v1385_v20 }
 0x4f2   :  { %1859 = vmatprep.subr.bf16.mxu1 %v1394_v21  ;;  %v1498_v21 = vld [vmem:[#allocation2 + $0x678] sm:$0xff] }
 0x4f5   :  { %1860 = vmatpush1.bf16.msra.mxu1 %v1393_v14 }
 0x4f6   :  { %1861 = vmatprep.subr.bf16.mxu1 %v1402_v25 }
 0x4f9   :  { %1862 = vmatpush1.bf16.msra.mxu1 %v1401_v26 }
 0x4fa   :  { %1863 = vmatprep.subr.bf16.mxu1 %v1410_v27 }
 0x4fd   :  { %1864 = vmatpush1.bf16.msra.mxu1 %v1409_v28 }
 0x4fe   :  { %1865 = vmatprep.subr.bf16.mxu1 %v1418_v29 }
 0x501   :  { %1866 = vmatpush1.bf16.msra.mxu1 %v1417_v31  ;;  %v1497_v31 = vld [vmem:[#allocation2 + $0x670] sm:$0xff] }
 0x502   :  { %1876 = vmatprep.subr.bf16.mxu1 %v1426_v33 }
 0x504   :  { %1868 = vmatmul.mubr.bf16.vlgmr.msra.gmra.mrb[20].mxu1 %v3504_v22  ;;  %v1457_v22 = vld [vmem:[#allocation2 + $0x530] sm:$0xff] }
 0x505   :  { %1877 = vmatpush1.bf16.msra.mxu1 %v1425_v34  ;;  %1908 = vmatprep.mubr.bf16.mxu1 %v3510_v16  ;;  %v1466_v16 = vld [vmem:[#allocation2 + $0x578] sm:$0xff] }
 0x506   :  { %1878 = vmatprep.subr.bf16.mxu1 %v1434_v35  ;;  %v1506_v35 = vld [vmem:[#allocation2 + $0x6b8] sm:$0xff] }
 0x509   :  { %1879 = vmatpush1.bf16.msra.mxu1 %v1433_v36 }
 0x50a   :  { %1880 = vmatprep.subr.bf16.mxu1 %v1442_v37 }
 0x50d   :  { %1881 = vmatpush1.bf16.msra.mxu1 %v1441_v38 }
 0x50e   :  { %1882 = vmatprep.subr.bf16.mxu1 %v1450_v39 }
 0x511   :  { %1883 = vmatpush1.bf16.msra.mxu1 %v1449_v40 }
 0x512   :  { %1884 = vmatprep.subr.bf16.mxu1 %v1458_v41 }
 0x515   :  { %1885 = vmatpush1.bf16.msra.mxu1 %v1457_v22  ;;  %v1505_v22 = vld [vmem:[#allocation2 + $0x6b0] sm:$0xff] }
 0x516   :  { %1886 = vmatprep.subr.bf16.mxu1 %v1466_v16 }
 0x517   :  { %v1623_v49 = vpop.f32.mrb[12].mxu1 }
 0x518   :  { %v1664_v51 = vpop.f32.mrb[4].mxu0  ;;  %v1624_v53 = vadd.f32 %v1623_v49, %v1552_v43  ;;  %v1625_v54 = vpop.f32.mrb[13].mxu1 }
 0x519   :  { %v1666_v55 = vpop.f32.mrb[5].mxu0  ;;  %v1626_v56 = vadd.f32 %v1625_v54, %v1556_v47  ;;  %v1627_v58 = vpop.f32.mrb[14].mxu1  ;;  %1887 = vmatpush1.bf16.msra.mxu1 %v1465_v48  ;;  %v1514_v47 = vld [vmem:[#allocation2 + $0x6f8] sm:$0xff] }
 0x51a   :  { %v1668_v60 = vpop.f32.mrb[6].mxu0  ;;  %v3536_v61 = vadd.f32 %v1664_v51, %v1624_v53  ;;  %v1628_v63 = vpop.f32.mrb[15].mxu1  ;;  %1888 = vmatprep.subr.bf16.mxu1 %v1474_v44  ;;  %v1513_v44 = vld [vmem:[#allocation2 + $0x6f0] sm:$0xff]  ;;  %v1522_v54 = vld [vmem:[#allocation2 + $0x738] sm:$0xff] }
 0x51b   :  { %v1669_v2 = vpop.f32.mrb[7].mxu0  ;;  %v3538_v3 = vadd.f32 %v1666_v55, %v1626_v56  ;;  %v1521_v55 = vld [vmem:[#allocation2 + $0x730] sm:$0xff]  ;;  %v1530_v56 = vld [vmem:[#allocation2 + $0x778] sm:$0xff] }
 0x51c   :  { %v1917_v30 = vrot.slane %v3536_v61, 4  ;;  %v1973_v32 = vmul.f32 %v3536_v61, %v3536_v61  ;;  %v1529_v58 = vld [vmem:[#allocation2 + $0x770] sm:$0xff]  ;;  %v1538_v60 = vld [vmem:[#allocation2 + $0x7b8] sm:$0xff] }
 0x51d   :  { %v1923_v5 = vrot.slane %v3538_v3, 4  ;;  %v1974_v62 = vmul.f32 %v3538_v3, %v3538_v3  ;;  %1889 = vmatpush1.bf16.msra.mxu1 %v1473_v1  ;;  %v1537_v1 = vld [vmem:[#allocation2 + $0x7b0] sm:$0xff] }
 0x51e   :  { %v1918_v0 = vadd.f32 %v1917_v30, %v3536_v61  ;;  %v1981_v50 = vrot.slane %v1973_v32, 4  ;;  %1890 = vmatprep.subr.bf16.mxu1 %v1482_v4  ;;  %v1546_v4 = vld [vmem:[#allocation2 + $0x7f8] sm:$0xff] }
 0x51f   :  { %v1924_v6 = vadd.f32 %v1923_v5, %v3538_v3  ;;  %v1987_v23 = vrot.slane %v1974_v62, 4  ;;  %v3564_v5 = vsub.s32 4, %v3419_v7 }
 0x520   :  { %v1919_v57 = vrot.slane %v1918_v0, 2  ;;  %v1982_v11 = vadd.f32 %v1981_v50, %v1973_v32  ;;  %v1545_v32 = vld [vmem:[#allocation2 + $0x7f0] sm:$0xff] }
 0x521   :  { %v1925_v12 = vrot.slane %v1924_v6, 2  ;;  %v1988_v13 = vadd.f32 %v1987_v23, %v1974_v62  ;;  %1891 = vmatpush1.bf16.msra.mxu1 %v1481_v52  ;;  %v3567_v62 = vsub.s32 5, %v3419_v7  ;;  %v1568_v50 = vrot.slane %v3530_v42, %v3564_v5 }
 0x522   :  { %v1920_v15 = vadd.f32 %v1919_v57, %v1918_v0  ;;  %v1983_v17 = vrot.slane %v1982_v11, 2  ;;  %1892 = vmatprep.subr.bf16.mxu1 %v1490_v9  ;;  %v1560_v0 = vrot.slane %v3530_v42, %v3473_v45  ;;  %v1564_v52 = vrot.slane %v3530_v42, %v3476_v46 }
 0x523   :  { %v1926_v19 = vadd.f32 %v1925_v12, %v1924_v6  ;;  %v1989_v20 = vrot.slane %v1988_v13, 2  ;;  %v1572_v6 = vrot.slane %v3530_v42, %v3567_v62 }
 0x524   :  { %v1921_v14 = vrot.slane %v1920_v15, 1  ;;  %v1984_v25 = vadd.f32 %v1983_v17, %v1982_v11 }
 0x525   :  { %v1927_v26 = vrot.slane %v1926_v19, 1  ;;  %v1990_v27 = vadd.f32 %v1989_v20, %v1988_v13  ;;  %1893 = vmatpush1.bf16.msra.mxu1 %v1489_v18 }
 0x526   :  { %v1922_v28 = vadd.f32 %v1921_v14, %v1920_v15  ;;  %v1985_v29 = vrot.slane %v1984_v25, 1  ;;  %1894 = vmatprep.subr.bf16.mxu1 %v1498_v21 }
 0x527   :  { %v1928_v33 = vadd.f32 %v1927_v26, %v1926_v19  ;;  %v1991_v34 = vrot.slane %v1990_v27, 1 }
 0x528   :  { %v3548_v36 = vmul.f32 0.125, %v1922_v28  ;;  %v1986_v37 = vadd.f32 %v1985_v29, %v1984_v25 }
 0x529   :  { %v3550_v38 = vmul.f32 0.125, %v1928_v33  ;;  %v1992_v39 = vadd.f32 %v1991_v34, %v1990_v27  ;;  %1895 = vmatpush1.bf16.msra.mxu1 %v1497_v31 }
 0x52a   :  { %v2029_v40 = vmul.f32 0.125, %v1986_v37  ;;  %v2037_v41 = vmul.f32 %v3548_v36, %v3548_v36  ;;  %1896 = vmatprep.subr.bf16.mxu1 %v1506_v35 }
 0x52b   :  { %v2030_v16 = vmul.f32 0.125, %v1992_v39  ;;  %v2038_v43 = vmul.f32 %v3550_v38, %v3550_v38 }
 0x52c   :  { %v2045_v48 = vsub.f32 %v2029_v40, %v2037_v41 }
 0x52d   :  { %v2046_v49 = vsub.f32 %v2030_v16, %v2038_v43  ;;  %1897 = vmatpush1.bf16.msra.mxu1 %v1505_v22 }
 0x52e   :  { %v2053_v51 = vadd.f32 0.8, %v2045_v48  ;;  %1898 = vmatprep.subr.bf16.mxu1 %v1514_v47 }
 0x52f   :  { %v2054_v53 = vadd.f32 0.8, %v2046_v49 }
 0x530   :  { %2995 = vrsqrt.f32 %v2053_v51 }
 0x531   :  { %2997 = vrsqrt.f32 %v2054_v53  ;;  %1899 = vmatpush1.bf16.msra.mxu1 %v1513_v44 }
 0x532   :  { %1900 = vmatprep.subr.bf16.mxu1 %v1522_v54 }
 0x535   :  { %1901 = vmatpush1.bf16.msra.mxu1 %v1521_v55 }
 0x536   :  { %1902 = vmatprep.subr.bf16.mxu1 %v1530_v56 }
 0x539   :  { %1903 = vmatpush1.bf16.msra.mxu1 %v1529_v58 }
 0x53a   :  { %v3556_v63 = vpop.eup %2995  ;;  %1904 = vmatprep.subr.bf16.mxu1 %v1538_v60 }
 0x53b   :  { %v3558_v2 = vpop.eup %2997 }
 0x53c   :  { %v2078_v30 = vcombine.low %v3556_v63, %v3558_v2 }
 0x53d   :  { %1905 = vmatpush1.bf16.msra.mxu1 %v1537_v1 }
 0x53e   :  { %1906 = vmatprep.subr.bf16.mxu1 %v1546_v4 }
 0x541   :  { %1907 = vmatpush1.bf16.msra.mxu1 %v1545_v32 }
 0x544   :  { %1909 = vmatmul.mubr.bf16.vlgmr.msra.gmra.mrb[20].mxu1 %v3508_v24 }
 0x597   :  { %v1746_v23 = vpop.f32.mrb[16].mxu1 }
 0x598   :  { %v1828_v24 = vpop.f32.mrb[8].mxu0  ;;  %v3577_v9 = vadd.f32 %v1746_v23, %v1560_v0  ;;  %v1748_v57 = vpop.f32.mrb[17].mxu1 }
 0x599   :  { %v3579_v11 = vadd.f32 %v1828_v24, %v1568_v50  ;;  %v1830_v12 = vpop.f32.mrb[9].mxu0  ;;  %v3581_v13 = vadd.f32 %v1748_v57, %v1564_v52  ;;  %v1750_v15 = vpop.f32.mrb[18].mxu1 }
 0x59a   :  { %v3583_v17 = vadd.f32 %v1830_v12, %v1572_v6  ;;  %v1832_v18 = vpop.f32.mrb[10].mxu0  ;;  %v1929_v19 = vrot.slane %v3577_v9, 4  ;;  %v1975_v20 = vmul.f32 %v3577_v9, %v3577_v9  ;;  %v1751_v21 = vpop.f32.mrb[19].mxu1 }
 0x59b   :  { %v1941_v14 = vrot.slane %v3579_v11, 4  ;;  %v1977_v25 = vmul.f32 %v3579_v11, %v3579_v11  ;;  %v1833_v26 = vpop.f32.mrb[11].mxu0  ;;  %v1935_v27 = vrot.slane %v3581_v13, 4  ;;  %v1976_v28 = vmul.f32 %v3581_v13, %v3581_v13 }
 0x59c   :  { %v1947_v29 = vrot.slane %v3583_v17, 4  ;;  %v1978_v31 = vmul.f32 %v3583_v17, %v3583_v17  ;;  %v1930_v33 = vadd.f32 %v3577_v9, %v1929_v19  ;;  %v1993_v34 = vrot.slane %v1975_v20, 4 }
 0x59d   :  { %v1942_v35 = vadd.f32 %v3579_v11, %v1941_v14  ;;  %v2005_v37 = vrot.slane %v1977_v25, 4  ;;  %v1936_v39 = vadd.f32 %v3581_v13, %v1935_v27  ;;  %v1999_v40 = vrot.slane %v1976_v28, 4 }
 0x59e   :  { %v1948_v41 = vadd.f32 %v3583_v17, %v1947_v29  ;;  %v2011_v22 = vrot.slane %v1978_v31, 4  ;;  %v1931_v16 = vrot.slane %v1930_v33, 2  ;;  %v1994_v43 = vadd.f32 %v1993_v34, %v1975_v20 }
 0x59f   :  { %v1943_v47 = vrot.slane %v1942_v35, 2  ;;  %v2006_v48 = vadd.f32 %v2005_v37, %v1977_v25  ;;  %v1937_v49 = vrot.slane %v1936_v39, 2  ;;  %v2000_v51 = vadd.f32 %v1999_v40, %v1976_v28 }
 0x5a0   :  { %v1949_v44 = vrot.slane %v1948_v41, 2  ;;  %v2012_v53 = vadd.f32 %v2011_v22, %v1978_v31  ;;  %v1932_v54 = vadd.f32 %v1931_v16, %v1930_v33  ;;  %v1995_v55 = vrot.slane %v1994_v43, 2 }
 0x5a1   :  { %v1944_v56 = vadd.f32 %v1943_v47, %v1942_v35  ;;  %v2007_v58 = vrot.slane %v2006_v48, 2  ;;  %v1938_v60 = vadd.f32 %v1937_v49, %v1936_v39  ;;  %v2001_v1 = vrot.slane %v2000_v51, 2 }
 0x5a2   :  { %v1950_v4 = vadd.f32 %v1949_v44, %v1948_v41  ;;  %v2013_v32 = vrot.slane %v2012_v53, 2  ;;  %v1933_v0 = vrot.slane %v1932_v54, 1  ;;  %v1996_v50 = vadd.f32 %v1995_v55, %v1994_v43 }
 0x5a3   :  { %v1945_v52 = vrot.slane %v1944_v56, 1  ;;  %v2008_v6 = vadd.f32 %v2007_v58, %v2006_v48  ;;  %v1939_v23 = vrot.slane %v1938_v60, 1  ;;  %v2002_v24 = vadd.f32 %v2001_v1, %v2000_v51 }
 0x5a4   :  { %v1951_v57 = vrot.slane %v1950_v4, 1  ;;  %v2014_v12 = vadd.f32 %v2013_v32, %v2012_v53  ;;  %v1934_v15 = vadd.f32 %v1933_v0, %v1932_v54  ;;  %v1997_v18 = vrot.slane %v1996_v50, 1 }
 0x5a5   :  { %v1946_v19 = vadd.f32 %v1945_v52, %v1944_v56  ;;  %v2009_v20 = vrot.slane %v2008_v6, 1  ;;  %v1940_v21 = vadd.f32 %v1939_v23, %v1938_v60  ;;  %v2003_v14 = vrot.slane %v2002_v24, 1 }
 0x5a6   :  { %v1952_v25 = vadd.f32 %v1951_v57, %v1950_v4  ;;  %v2015_v26 = vrot.slane %v2014_v12, 1  ;;  %v3601_v27 = vmul.f32 0.125, %v1934_v15  ;;  %v1998_v28 = vadd.f32 %v1997_v18, %v1996_v50 }
 0x5a7   :  { %v3603_v29 = vmul.f32 0.125, %v1946_v19  ;;  %v2010_v31 = vadd.f32 %v2009_v20, %v2008_v6  ;;  %v3605_v33 = vmul.f32 0.125, %v1940_v21  ;;  %v2004_v34 = vadd.f32 %v2003_v14, %v2002_v24 }
 0x5a8   :  { %v3607_v35 = vmul.f32 0.125, %v1952_v25  ;;  %v2016_v37 = vadd.f32 %v2015_v26, %v2014_v12  ;;  %v2031_v39 = vmul.f32 0.125, %v1998_v28  ;;  %v2039_v40 = vmul.f32 %v3601_v27, %v3601_v27 }
 0x5a9   :  { %v2033_v41 = vmul.f32 0.125, %v2010_v31  ;;  %v2041_v22 = vmul.f32 %v3603_v29, %v3603_v29  ;;  %v2032_v16 = vmul.f32 0.125, %v2004_v34  ;;  %v2040_v43 = vmul.f32 %v3605_v33, %v3605_v33 }
 0x5aa   :  { %v2034_v47 = vmul.f32 0.125, %v2016_v37  ;;  %v2042_v48 = vmul.f32 %v3607_v35, %v3607_v35  ;;  %v2047_v49 = vsub.f32 %v2031_v39, %v2039_v40  ;;  %v2088_v50 = vrot.slane %v2078_v30, %v3430_v59 }
 0x5ab   :  { %v2049_v51 = vsub.f32 %v2033_v41, %v2041_v22  ;;  %v2048_v44 = vsub.f32 %v2032_v16, %v2040_v43  ;;  %v3623_v24 = vsub.s32 6, %v3419_v7  ;;  %v3626_v57 = vsub.s32 7, %v3419_v7 }
 0x5ac   :  { %v2050_v53 = vsub.f32 %v2034_v47, %v2042_v48  ;;  %v2055_v54 = vadd.f32 0.8, %v2047_v49 }
 0x5ad   :  { %v2057_v55 = vadd.f32 0.8, %v2049_v51  ;;  %v2056_v56 = vadd.f32 0.8, %v2048_v44  ;;  %v1576_v12 = vrot.slane %v3530_v42, %v3623_v24  ;;  %v1580_v15 = vrot.slane %v3530_v42, %v3626_v57 }
 0x5ae   :  { %v2058_v58 = vadd.f32 0.8, %v2050_v53  ;;  %2999 = vrsqrt.f32 %v2055_v54 }
 0x5af   :  { %3001 = vrsqrt.f32 %v2056_v56 }
 0x5b0   :  { %3003 = vrsqrt.f32 %v2057_v55 }
 0x5b1   :  { %3005 = vrsqrt.f32 %v2058_v58 }
 0x5b8   :  { %v3000_v60 = vpop.eup %2999 }
 0x5b9   :  { %v3002_v1 = vpop.eup %3001 }
 0x5ba   :  { %v3004_v4 = vpop.eup %3003  ;;  %v2079_v32 = vcombine.low %v3000_v60, %v3002_v1 }
 0x5bb   :  { %v3006_v0 = vpop.eup %3005 }
 0x5bc   :  { %v2095_v52 = vrot.slane %v2079_v32, %v3430_v59  ;;  %v2080_v6 = vcombine.low %v3004_v4, %v3006_v0 }
 0x5be   :  { %v2110_v23 = vcombine.low %v2088_v50, %v2095_v52 }
 0x617   :  { %v1910_v18 = vpop.f32.mrb[20].mxu1 }
 0x618   :  { %v3632_v19 = vadd.f32 %v1910_v18, %v1576_v12  ;;  %v1912_v63 = vpop.f32.mrb[21].mxu1 }
 0x619   :  { %v3634_v2 = vadd.f32 %v1912_v63, %v1580_v15  ;;  %v1914_v30 = vpop.f32.mrb[22].mxu1 }
 0x61a   :  { %v1953_v20 = vrot.slane %v3632_v19, 4  ;;  %v1979_v21 = vmul.f32 %v3632_v19, %v3632_v19  ;;  %v1915_v7 = vpop.f32.mrb[23].mxu1 }
 0x61b   :  { %v1959_v14 = vrot.slane %v3634_v2, 4  ;;  %v1980_v25 = vmul.f32 %v3634_v2, %v3634_v2 }
 0x61c   :  { %v1954_v42 = vadd.f32 %v3632_v19, %v1953_v20  ;;  %v2017_v26 = vrot.slane %v1979_v21, 4 }
 0x61d   :  { %v1960_v28 = vadd.f32 %v3634_v2, %v1959_v14  ;;  %v2023_v31 = vrot.slane %v1980_v25, 4 }
 0x61e   :  { %v1955_v34 = vrot.slane %v1954_v42, 2  ;;  %v2018_v37 = vadd.f32 %v2017_v26, %v1979_v21  ;;  %v2102_v21 = vrot.slane %v2080_v6, %v3430_v59  ;;  %v2069_v26 = vld [vmem:[%s3765_s13] sm:$0xff] }
 0x61f   :  { %v1961_v39 = vrot.slane %v1960_v28, 2  ;;  %v2024_v40 = vadd.f32 %v2023_v31, %v1980_v25  ;;  %v2118_v25 = vrot.slane %v2110_v23, %v3430_v59 }
 0x620   :  { %v1956_v41 = vadd.f32 %v1955_v34, %v1954_v42  ;;  %v2019_v22 = vrot.slane %v2018_v37, 2 }
 0x621   :  { %v1962_v16 = vadd.f32 %v1961_v39, %v1960_v28  ;;  %v2025_v43 = vrot.slane %v2024_v40, 2 }
 0x622   :  { %v1957_v47 = vrot.slane %v1956_v41, 1  ;;  %v2020_v48 = vadd.f32 %v2019_v22, %v2018_v37 }
 0x623   :  { %v1963_v49 = vrot.slane %v1962_v16, 1  ;;  %v2026_v51 = vadd.f32 %v2025_v43, %v2024_v40 }
 0x624   :  { %v1958_v44 = vadd.f32 %v1957_v47, %v1956_v41  ;;  %v2021_v53 = vrot.slane %v2020_v48, 1 }
 0x625   :  { %v1964_v54 = vadd.f32 %v1963_v49, %v1962_v16  ;;  %v2027_v55 = vrot.slane %v2026_v51, 1 }
 0x626   :  { %v1971_v56 = vmul.f32 0.125, %v1958_v44  ;;  %v2022_v58 = vadd.f32 %v2021_v53, %v2020_v48 }
 0x627   :  { %v1972_v60 = vmul.f32 0.125, %v1964_v54  ;;  %v2028_v1 = vadd.f32 %v2027_v55, %v2026_v51 }
 0x628   :  { %v2035_v4 = vmul.f32 0.125, %v2022_v58  ;;  %v2043_v32 = vmul.f32 %v1971_v56, %v1971_v56 }
 0x629   :  { %v2036_v0 = vmul.f32 0.125, %v2028_v1  ;;  %v2044_v50 = vmul.f32 %v1972_v60, %v1972_v60 }
 0x62a   :  { %v2051_v52 = vsub.f32 %v2035_v4, %v2043_v32 }
 0x62b   :  { %v2052_v12 = vsub.f32 %v2036_v0, %v2044_v50 }
 0x62c   :  { %v2059_v15 = vadd.f32 0.8, %v2051_v52 }
 0x62d   :  { %v2060_v18 = vadd.f32 0.8, %v2052_v12 }
 0x62e   :  { %3007 = vrsqrt.f32 %v2059_v15 }
 0x62f   :  { %3009 = vrsqrt.f32 %v2060_v18 }
 0x638   :  { %v3008_v63 = vpop.eup %3007 }
 0x639   :  { %v3010_v30 = vpop.eup %3009 }
 0x63a   :  { %v2081_v20 = vcombine.low %v3008_v63, %v3010_v30 }
 0x63c   :  { %v2109_v7 = vrot.slane %v2081_v20, %v3430_v59 }
 0x63e   :  { %v2111_v14 = vcombine.low %v2102_v21, %v2109_v7 }
 0x640   :  { %v2125_v42 = vrot.slane %v2111_v14, %v3430_v59 }
 0x642   :  { %v2126_v28 = vcombine.low %v2118_v25, %v2125_v42 }
 0x644   :  { %v2128_v31 = vmul.f32 %v2126_v28, %v2069_v26 }
 0x646   :  { %v2134_v34 = vrot.slane %v2128_v31, %v3422_v8  ;;  %v2138_v37 = vrot.slane %v2128_v31, %v3425_v10  ;;  %v2142_v39 = vrot.slane %v2128_v31, %v3473_v45  ;;  %v2146_v6 = vrot.slane %v2128_v31, %v3476_v46 }
 0x647   :  { %v2150_v40 = vrot.slane %v2128_v31, %v3564_v5  ;;  %v2154_v23 = vrot.slane %v2128_v31, %v3567_v62  ;;  %v2158_v41 = vrot.slane %v2128_v31, %v3623_v24  ;;  %v2162_v22 = vrot.slane %v2128_v31, %v3626_v57 }
 0x648   :  { %v2171_v16 = vmul.f32 %v2134_v34, %v3548_v36  ;;  %v2172_v43 = vmul.f32 %v2138_v37, %v3550_v38  ;;  %v2173_v47 = vmul.f32 %v2142_v39, %v3601_v27  ;;  %v2174_v48 = vmul.f32 %v2146_v6, %v3605_v33 }
 0x649   :  { %v2175_v49 = vmul.f32 %v2150_v40, %v3603_v29  ;;  %v2176_v51 = vmul.f32 %v2154_v23, %v3607_v35  ;;  %v2177_v44 = vmul.f32 %v2158_v41, %v1971_v56  ;;  %v2178_v53 = vmul.f32 %v2162_v22, %v1972_v60 }
 0x64a   :  { %v2187_v54 = vcombine.low %v2171_v16, %v2172_v43  ;;  %v2188_v55 = vcombine.low %v2173_v47, %v2174_v48  ;;  %v2238_v58 = vmul.f32 %v2134_v34, %v3536_v61  ;;  %v2239_v1 = vmul.f32 %v2138_v37, %v3538_v3 }
 0x64b   :  { %v2189_v4 = vcombine.low %v2175_v49, %v2176_v51  ;;  %v2190_v36 = vcombine.low %v2177_v44, %v2178_v53  ;;  %v2240_v38 = vmul.f32 %v3577_v9, %v2142_v39  ;;  %v2241_v27 = vmul.f32 %v3581_v13, %v2146_v6 }
 0x64c   :  { %v2197_v33 = vrot.slane %v2187_v54, %v3430_v59  ;;  %v2204_v29 = vrot.slane %v2188_v55, %v3430_v59  ;;  %v2242_v35 = vmul.f32 %v3579_v11, %v2150_v40  ;;  %v2243_v56 = vmul.f32 %v3583_v17, %v2154_v23  ;;  %v2129_v11 = vld [vmem:[%s3766_s14] sm:$0xff] }
 0x64d   :  { %v2211_v60 = vrot.slane %v2189_v4, %v3430_v59  ;;  %v2218_v61 = vrot.slane %v2190_v36, %v3430_v59  ;;  %v2244_v3 = vmul.f32 %v3632_v19, %v2158_v41  ;;  %v2245_v32 = vmul.f32 %v3634_v2, %v2162_v22 }
 0x64e   :  { %v2219_v0 = vcombine.low %v2197_v33, %v2204_v29 }
 0x64f   :  { %v2220_v9 = vcombine.low %v2211_v60, %v2218_v61 }
 0x650   :  { %v2227_v13 = vrot.slane %v2219_v0, %v3430_v59 }
 0x651   :  { %v2234_v50 = vrot.slane %v2220_v9, %v3430_v59 }
 0x653   :  { %v2235_v52 = vcombine.low %v2227_v13, %v2234_v50 }
 0x655   :  { %v2237_v17 = vsub.f32 %v2129_v11, %v2235_v52 }
 0x657   :  { %v2250_v12 = vrot.slane %v2237_v17, %v3422_v8  ;;  %v2254_v15 = vrot.slane %v2237_v17, %v3425_v10  ;;  %v2258_v19 = vrot.slane %v2237_v17, %v3473_v45  ;;  %v2262_v2 = vrot.slane %v2237_v17, %v3476_v46 }
 0x658   :  { %v2266_v18 = vrot.slane %v2237_v17, %v3564_v5  ;;  %v2270_v63 = vrot.slane %v2237_v17, %v3567_v62  ;;  %v2274_v59 = vrot.slane %v2237_v17, %v3623_v24  ;;  %v2278_v30 = vrot.slane %v2237_v17, %v3626_v57 }
 0x659   :  { %v2287_v20 = vadd.f32 %v2250_v12, %v2238_v58  ;;  %v2288_v21 = vadd.f32 %v2254_v15, %v2239_v1  ;;  %v2289_v7 = vadd.f32 %v2258_v19, %v2240_v38  ;;  %v2290_v14 = vadd.f32 %v2262_v2, %v2241_v27 }
 0x65a   :  { %v2291_v25 = vadd.f32 %v2266_v18, %v2242_v35  ;;  %v2292_v42 = vadd.f32 %v2270_v63, %v2243_v56  ;;  %v2293_v26 = vadd.f32 %v2274_v59, %v2244_v3  ;;  %v2294_v28 = vadd.f32 %v2278_v30, %v2245_v32 }
 0x65b   :  { %vm2295_vm8 = vcmp.gt.f32.partialorder %v2287_v20, 0.0  ;;  %vm2296_vm9 = vcmp.gt.f32.partialorder %v2288_v21, 0.0  ;;  %vm2297_vm10 = vcmp.gt.f32.partialorder %v2289_v7, 0.0  ;;  %vm2298_vm11 = vcmp.gt.f32.partialorder %v2290_v14, 0.0 }
 0x65c   :  { %vm2299_vm12 = vcmp.gt.f32.partialorder %v2291_v25, 0.0  ;;  %vm2300_vm13 = vcmp.gt.f32.partialorder %v2292_v42, 0.0  ;;  %vm2301_vm14 = vcmp.gt.f32.partialorder %v2293_v26, 0.0  ;;  %vm2302_vm15 = vcmp.gt.f32.partialorder %v2294_v28, 0.0 }
 0x65d   :  { %v2303_v45 = vmul.f32 0.2, %v2287_v20  ;;  %v2304_v46 = vmul.f32 0.2, %v2288_v21  ;;  %v2305_v5 = vmul.f32 0.2, %v2289_v7 }
 0x65e   :  { %v2306_v62 = vmul.f32 0.2, %v2290_v14  ;;  %v2307_v24 = vmul.f32 0.2, %v2291_v25  ;;  %v2308_v57 = vmul.f32 0.2, %v2292_v42 }
 0x65f   :  { %v2309_v31 = vmul.f32 0.2, %v2293_v26  ;;  %v2310_v34 = vmul.f32 0.2, %v2294_v28  ;;  %v3691_v37 = vsel %vm2295_vm8, %v2287_v20, %v2303_v45  ;;  %v2312_v39 = vsel %vm2296_vm9, %v2288_v21, %v2304_v46 }
 0x660   :  { %v3695_v6 = vsel %vm2297_vm10, %v2289_v7, %v2305_v5  ;;  %v3698_v40 = vsel %vm2298_vm11, %v2290_v14, %v2306_v62  ;;  %v3701_v23 = vsel %vm2299_vm12, %v2291_v25, %v2307_v24  ;;  %v3704_v41 = vsel %vm2300_vm13, %v2292_v42, %v2308_v57 }
 0x661   :  { %v3707_v22 = vsel %vm2301_vm14, %v2293_v26, %v2309_v31  ;;  %v3710_v16 = vsel %vm2302_vm15, %v2294_v28, %v2310_v34  ;;  %v2319_v43 = vpack.c.bf16 %v3691_v37, %v3691_v37  ;;  %v2320_v47 = vpack.c.bf16 %v2312_v39, %v2312_v39 }
 0x662   :  { %v2321_v48 = vpack.c.bf16 %v3695_v6, %v3695_v6  ;;  %v2322_v49 = vpack.c.bf16 %v3698_v40, %v3698_v40  ;;  %v2323_v51 = vpack.c.bf16 %v3701_v23, %v3701_v23  ;;  %v2324_v44 = vpack.c.bf16 %v3704_v41, %v3704_v41 }
 0x663   :  { %v2325_v53 = vpack.c.bf16 %v3707_v22, %v3707_v22  ;;  %v2326_v54 = vpack.c.bf16 %v3710_v16, %v3710_v16 }
 0x664   :  { %3179 = dma.done.wait [#allocation4 + $0x1], 16384 }
 0x665   :  { %3180 = vsyncadd [#allocation4 + $0x1], 4294950912  ;;  %2503 = vmatprep.mubr.bf16.mxu0 %v2320_v47  ;;  %v2332_v55 = vld [vmem:[#allocation3 + $0x8] sm:$0xff]  ;;  %v2331_v58 = vld [vmem:[#allocation3] sm:$0xff] }
 0x666   :  { %v2334_v1 = vld [vmem:[#allocation3 + $0x18] sm:$0xff]  ;;  %2471 = vmatprep.subr.bf16.mxu0 %v2332_v55  ;;  %v2333_v4 = vld [vmem:[#allocation3 + $0x10] sm:$0xff]  ;;  %v2336_v36 = vld [vmem:[#allocation3 + $0x28] sm:$0xff] }
 0x667   :  { %2472 = vmatpush1.bf16.msra.mxu0 %v2331_v58  ;;  %v2335_v38 = vld [vmem:[#allocation3 + $0x20] sm:$0xff]  ;;  %v2338_v27 = vld [vmem:[#allocation3 + $0x38] sm:$0xff]  ;;  %v2337_v33 = vld [vmem:[#allocation3 + $0x30] sm:$0xff] }
 0x668   :  { %2473 = vmatprep.subr.bf16.mxu0 %v2334_v1  ;;  %v2340_v29 = vld [vmem:[#allocation3 + $0x48] sm:$0xff]  ;;  %v2339_v35 = vld [vmem:[#allocation3 + $0x40] sm:$0xff]  ;;  %v2342_v56 = vld [vmem:[#allocation3 + $0x58] sm:$0xff] }
 0x669   :  { %v2341_v60 = vld [vmem:[#allocation3 + $0x50] sm:$0xff]  ;;  %v2344_v61 = vld [vmem:[#allocation3 + $0x68] sm:$0xff]  ;;  %v2343_v3 = vld [vmem:[#allocation3 + $0x60] sm:$0xff] }
 0x66a   :  { %v2346_v32 = vld [vmem:[#allocation3 + $0x78] sm:$0xff]  ;;  %v2345_v0 = vld [vmem:[#allocation3 + $0x70] sm:$0xff]  ;;  %v2348_v9 = vld [vmem:[#allocation3 + $0x88] sm:$0xff] }
 0x66b   :  { %2474 = vmatpush1.bf16.msra.mxu0 %v2333_v4  ;;  %v2347_v13 = vld [vmem:[#allocation3 + $0x80] sm:$0xff]  ;;  %v2350_v50 = vld [vmem:[#allocation3 + $0x98] sm:$0xff]  ;;  %v2349_v11 = vld [vmem:[#allocation3 + $0x90] sm:$0xff] }
 0x66c   :  { %2475 = vmatprep.subr.bf16.mxu0 %v2336_v36  ;;  %v2352_v52 = vld [vmem:[#allocation3 + $0xa8] sm:$0xff]  ;;  %v2351_v17 = vld [vmem:[#allocation3 + $0xa0] sm:$0xff]  ;;  %v2354_v12 = vld [vmem:[#allocation3 + $0xb8] sm:$0xff] }
 0x66d   :  { %v2353_v15 = vld [vmem:[#allocation3 + $0xb0] sm:$0xff]  ;;  %v2356_v19 = vld [vmem:[#allocation3 + $0xc8] sm:$0xff]  ;;  %v2355_v2 = vld [vmem:[#allocation3 + $0xc0] sm:$0xff] }
 0x66e   :  { %v2358_v18 = vld [vmem:[#allocation3 + $0xd8] sm:$0xff]  ;;  %v2357_v63 = vld [vmem:[#allocation3 + $0xd0] sm:$0xff]  ;;  %v2360_v59 = vld [vmem:[#allocation3 + $0xe8] sm:$0xff] }
 0x66f   :  { %2476 = vmatpush1.bf16.msra.mxu0 %v2335_v38  ;;  %v2359_v30 = vld [vmem:[#allocation3 + $0xe0] sm:$0xff]  ;;  %v2362_v20 = vld [vmem:[#allocation3 + $0xf8] sm:$0xff]  ;;  %v2361_v21 = vld [vmem:[#allocation3 + $0xf0] sm:$0xff] }
 0x670   :  { %2477 = vmatprep.subr.bf16.mxu0 %v2338_v27  ;;  %v2364_v7 = vld [vmem:[#allocation3 + $0x108] sm:$0xff]  ;;  %v2363_v14 = vld [vmem:[#allocation3 + $0x100] sm:$0xff]  ;;  %v2366_v25 = vld [vmem:[#allocation3 + $0x118] sm:$0xff] }
 0x671   :  { %v2365_v42 = vld [vmem:[#allocation3 + $0x110] sm:$0xff]  ;;  %v2368_v26 = vld [vmem:[#allocation3 + $0x128] sm:$0xff]  ;;  %v2367_v28 = vld [vmem:[#allocation3 + $0x120] sm:$0xff] }
 0x672   :  { %v2370_v45 = vld [vmem:[#allocation3 + $0x138] sm:$0xff]  ;;  %v2369_v46 = vld [vmem:[#allocation3 + $0x130] sm:$0xff]  ;;  %v2372_v5 = vld [vmem:[#allocation3 + $0x148] sm:$0xff] }
 0x673   :  { %2478 = vmatpush1.bf16.msra.mxu0 %v2337_v33  ;;  %v2371_v62 = vld [vmem:[#allocation3 + $0x140] sm:$0xff]  ;;  %v2374_v24 = vld [vmem:[#allocation3 + $0x158] sm:$0xff]  ;;  %v2373_v57 = vld [vmem:[#allocation3 + $0x150] sm:$0xff] }
 0x674   :  { %2479 = vmatprep.subr.bf16.mxu0 %v2340_v29  ;;  %v2376_v31 = vld [vmem:[#allocation3 + $0x168] sm:$0xff]  ;;  %v2375_v34 = vld [vmem:[#allocation3 + $0x160] sm:$0xff]  ;;  %v2378_v37 = vld [vmem:[#allocation3 + $0x178] sm:$0xff] }
 0x675   :  { %v2377_v39 = vld [vmem:[#allocation3 + $0x170] sm:$0xff]  ;;  %v2380_v40 = vld [vmem:[#allocation3 + $0x188] sm:$0xff]  ;;  %v2382_v47 = vld [vmem:[#allocation3 + $0x198] sm:$0xff] }
 0x676   :  { %v2384_v55 = vld [vmem:[#allocation3 + $0x1a8] sm:$0xff]  ;;  %v2383_v58 = vld [vmem:[#allocation3 + $0x1a0] sm:$0xff]  ;;  %v2386_v1 = vld [vmem:[#allocation3 + $0x1b8] sm:$0xff] }
 0x677   :  { %2480 = vmatpush1.bf16.msra.mxu0 %v2339_v35  ;;  %v2385_v4 = vld [vmem:[#allocation3 + $0x1b0] sm:$0xff]  ;;  %v2388_v36 = vld [vmem:[#allocation3 + $0x1c8] sm:$0xff]  ;;  %v2387_v38 = vld [vmem:[#allocation3 + $0x1c0] sm:$0xff] }
 0x678   :  { %2481 = vmatprep.subr.bf16.mxu0 %v2342_v56  ;;  %v2390_v27 = vld [vmem:[#allocation3 + $0x1d8] sm:$0xff]  ;;  %v2389_v33 = vld [vmem:[#allocation3 + $0x1d0] sm:$0xff]  ;;  %v2392_v29 = vld [vmem:[#allocation3 + $0x1e8] sm:$0xff] }
 0x679   :  { %v2391_v35 = vld [vmem:[#allocation3 + $0x1e0] sm:$0xff]  ;;  %v2394_v56 = vld [vmem:[#allocation3 + $0x1f8] sm:$0xff]  ;;  %v2408_v41 = vld [vmem:[#allocation3 + $0x268] sm:$0xff] }
 0x67a   :  { %v2403_v6 = vld [vmem:[#allocation3 + $0x240] sm:$0xff]  ;;  %v2440_v16 = vld [vmem:[#allocation3 + $0x368] sm:$0xff] }
 0x67b   :  { %2482 = vmatpush1.bf16.msra.mxu0 %v2341_v60  ;;  %v2393_v60 = vld [vmem:[#allocation3 + $0x1f0] sm:$0xff]  ;;  %v2435_v23 = vld [vmem:[#allocation3 + $0x340] sm:$0xff] }
 0x67c   :  { %2483 = vmatprep.subr.bf16.mxu0 %v2344_v61  ;;  %v2396_v61 = vld [vmem:[#allocation3 + $0x208] sm:$0xff] }
 0x67f   :  { %2484 = vmatpush1.bf16.msra.mxu0 %v2343_v3  ;;  %v2395_v3 = vld [vmem:[#allocation3 + $0x200] sm:$0xff] }
 0x680   :  { %2485 = vmatprep.subr.bf16.mxu0 %v2346_v32  ;;  %v2398_v32 = vld [vmem:[#allocation3 + $0x218] sm:$0xff] }
 0x683   :  { %2486 = vmatpush1.bf16.msra.mxu0 %v2345_v0  ;;  %v2397_v0 = vld [vmem:[#allocation3 + $0x210] sm:$0xff] }
 0x684   :  { %2487 = vmatprep.subr.bf16.mxu0 %v2348_v9  ;;  %v2400_v9 = vld [vmem:[#allocation3 + $0x228] sm:$0xff] }
 0x687   :  { %2488 = vmatpush1.bf16.msra.mxu0 %v2347_v13  ;;  %v2399_v13 = vld [vmem:[#allocation3 + $0x220] sm:$0xff] }
 0x688   :  { %2489 = vmatprep.subr.bf16.mxu0 %v2350_v50  ;;  %v2402_v50 = vld [vmem:[#allocation3 + $0x238] sm:$0xff] }
 0x68b   :  { %2490 = vmatpush1.bf16.msra.mxu0 %v2349_v11  ;;  %v2401_v11 = vld [vmem:[#allocation3 + $0x230] sm:$0xff] }
 0x68c   :  { %2491 = vmatprep.subr.bf16.mxu0 %v2352_v52  ;;  %v2404_v52 = vld [vmem:[#allocation3 + $0x248] sm:$0xff] }
 0x68f   :  { %2492 = vmatpush1.bf16.msra.mxu0 %v2351_v17  ;;  %v2405_v17 = vld [vmem:[#allocation3 + $0x250] sm:$0xff] }
 0x690   :  { %2493 = vmatprep.subr.bf16.mxu0 %v2354_v12  ;;  %v2410_v12 = vld [vmem:[#allocation3 + $0x278] sm:$0xff] }
 0x693   :  { %2494 = vmatpush1.bf16.msra.mxu0 %v2353_v15  ;;  %v2409_v15 = vld [vmem:[#allocation3 + $0x270] sm:$0xff] }
 0x694   :  { %2495 = vmatprep.subr.bf16.mxu0 %v2356_v19  ;;  %v2412_v19 = vld [vmem:[#allocation3 + $0x288] sm:$0xff] }
 0x697   :  { %2496 = vmatpush1.bf16.msra.mxu0 %v2355_v2  ;;  %v2411_v2 = vld [vmem:[#allocation3 + $0x280] sm:$0xff] }
 0x698   :  { %2497 = vmatprep.subr.bf16.mxu0 %v2358_v18  ;;  %v2414_v18 = vld [vmem:[#allocation3 + $0x298] sm:$0xff] }
 0x69b   :  { %2498 = vmatpush1.bf16.msra.mxu0 %v2357_v63  ;;  %v2413_v63 = vld [vmem:[#allocation3 + $0x290] sm:$0xff] }
 0x69c   :  { %2499 = vmatprep.subr.bf16.mxu0 %v2360_v59  ;;  %v2416_v59 = vld [vmem:[#allocation3 + $0x2a8] sm:$0xff] }
 0x69f   :  { %2500 = vmatpush1.bf16.msra.mxu0 %v2359_v30  ;;  %v2415_v30 = vld [vmem:[#allocation3 + $0x2a0] sm:$0xff] }
 0x6a0   :  { %2501 = vmatprep.subr.bf16.mxu0 %v2362_v20  ;;  %v2418_v20 = vld [vmem:[#allocation3 + $0x2b8] sm:$0xff] }
 0x6a3   :  { %2502 = vmatpush1.bf16.msra.mxu0 %v2361_v21  ;;  %v2417_v21 = vld [vmem:[#allocation3 + $0x2b0] sm:$0xff] }
 0x6a4   :  { %2512 = vmatprep.subr.bf16.mxu0 %v2364_v7  ;;  %v2420_v7 = vld [vmem:[#allocation3 + $0x2c8] sm:$0xff] }
 0x6a6   :  { %2504 = vmatmul.mubr.bf16.vlgmr.msra.gmra.mrb[12].mxu0 %v2319_v43  ;;  %v2379_v43 = vld [vmem:[#allocation3 + $0x180] sm:$0xff] }
 0x6a7   :  { %2513 = vmatpush1.bf16.msra.mxu0 %v2363_v14  ;;  %2544 = vmatprep.mubr.bf16.mxu0 %v2322_v49  ;;  %v2381_v49 = vld [vmem:[#allocation3 + $0x190] sm:$0xff]  ;;  %v2419_v14 = vld [vmem:[#allocation3 + $0x2c0] sm:$0xff] }
 0x6a8   :  { %2514 = vmatprep.subr.bf16.mxu0 %v2366_v25  ;;  %v2422_v25 = vld [vmem:[#allocation3 + $0x2d8] sm:$0xff] }
 0x6ab   :  { %2515 = vmatpush1.bf16.msra.mxu0 %v2365_v42  ;;  %v2421_v42 = vld [vmem:[#allocation3 + $0x2d0] sm:$0xff] }
 0x6ac   :  { %2516 = vmatprep.subr.bf16.mxu0 %v2368_v26  ;;  %v2424_v26 = vld [vmem:[#allocation3 + $0x2e8] sm:$0xff] }
 0x6af   :  { %2517 = vmatpush1.bf16.msra.mxu0 %v2367_v28  ;;  %v2423_v28 = vld [vmem:[#allocation3 + $0x2e0] sm:$0xff] }
 0x6b0   :  { %2518 = vmatprep.subr.bf16.mxu0 %v2370_v45  ;;  %v2426_v45 = vld [vmem:[#allocation3 + $0x2f8] sm:$0xff] }
 0x6b3   :  { %2519 = vmatpush1.bf16.msra.mxu0 %v2369_v46  ;;  %v2425_v46 = vld [vmem:[#allocation3 + $0x2f0] sm:$0xff] }
 0x6b4   :  { %2520 = vmatprep.subr.bf16.mxu0 %v2372_v5  ;;  %v2428_v5 = vld [vmem:[#allocation3 + $0x308] sm:$0xff] }
 0x6b7   :  { %2521 = vmatpush1.bf16.msra.mxu0 %v2371_v62  ;;  %v2427_v62 = vld [vmem:[#allocation3 + $0x300] sm:$0xff] }
 0x6b8   :  { %2522 = vmatprep.subr.bf16.mxu0 %v2374_v24  ;;  %v2430_v24 = vld [vmem:[#allocation3 + $0x318] sm:$0xff] }
 0x6bb   :  { %2523 = vmatpush1.bf16.msra.mxu0 %v2373_v57  ;;  %v2429_v57 = vld [vmem:[#allocation3 + $0x310] sm:$0xff] }
 0x6bc   :  { %2524 = vmatprep.subr.bf16.mxu0 %v2376_v31  ;;  %v2432_v31 = vld [vmem:[#allocation3 + $0x328] sm:$0xff] }
 0x6bf   :  { %2525 = vmatpush1.bf16.msra.mxu0 %v2375_v34  ;;  %v2431_v34 = vld [vmem:[#allocation3 + $0x320] sm:$0xff] }
 0x6c0   :  { %2526 = vmatprep.subr.bf16.mxu0 %v2378_v37  ;;  %v2434_v37 = vld [vmem:[#allocation3 + $0x338] sm:$0xff] }
 0x6c3   :  { %2527 = vmatpush1.bf16.msra.mxu0 %v2377_v39  ;;  %v2433_v39 = vld [vmem:[#allocation3 + $0x330] sm:$0xff] }
 0x6c4   :  { %2528 = vmatprep.subr.bf16.mxu0 %v2380_v40  ;;  %v2436_v40 = vld [vmem:[#allocation3 + $0x348] sm:$0xff] }
 0x6c7   :  { %2529 = vmatpush1.bf16.msra.mxu0 %v2379_v43  ;;  %v2437_v43 = vld [vmem:[#allocation3 + $0x350] sm:$0xff] }
 0x6c8   :  { %2530 = vmatprep.subr.bf16.mxu0 %v2382_v47  ;;  %v2442_v47 = vld [vmem:[#allocation3 + $0x378] sm:$0xff] }
 0x6cb   :  { %2531 = vmatpush1.bf16.msra.mxu0 %v2381_v49  ;;  %v2441_v49 = vld [vmem:[#allocation3 + $0x370] sm:$0xff] }
 0x6cc   :  { %2532 = vmatprep.subr.bf16.mxu0 %v2384_v55  ;;  %v2444_v55 = vld [vmem:[#allocation3 + $0x388] sm:$0xff] }
 0x6cf   :  { %2533 = vmatpush1.bf16.msra.mxu0 %v2383_v58  ;;  %v2443_v58 = vld [vmem:[#allocation3 + $0x380] sm:$0xff] }
 0x6d0   :  { %2534 = vmatprep.subr.bf16.mxu0 %v2386_v1  ;;  %v2446_v1 = vld [vmem:[#allocation3 + $0x398] sm:$0xff] }
 0x6d3   :  { %2535 = vmatpush1.bf16.msra.mxu0 %v2385_v4  ;;  %v2445_v4 = vld [vmem:[#allocation3 + $0x390] sm:$0xff] }
 0x6d4   :  { %2536 = vmatprep.subr.bf16.mxu0 %v2388_v36  ;;  %v2448_v36 = vld [vmem:[#allocation3 + $0x3a8] sm:$0xff] }
 0x6d7   :  { %2537 = vmatpush1.bf16.msra.mxu0 %v2387_v38  ;;  %v2447_v38 = vld [vmem:[#allocation3 + $0x3a0] sm:$0xff] }
 0x6d8   :  { %2538 = vmatprep.subr.bf16.mxu0 %v2390_v27  ;;  %v2450_v27 = vld [vmem:[#allocation3 + $0x3b8] sm:$0xff] }
 0x6db   :  { %2539 = vmatpush1.bf16.msra.mxu0 %v2389_v33  ;;  %v2449_v33 = vld [vmem:[#allocation3 + $0x3b0] sm:$0xff] }
 0x6dc   :  { %2540 = vmatprep.subr.bf16.mxu0 %v2392_v29  ;;  %v2452_v29 = vld [vmem:[#allocation3 + $0x3c8] sm:$0xff] }
 0x6df   :  { %2541 = vmatpush1.bf16.msra.mxu0 %v2391_v35  ;;  %v2451_v35 = vld [vmem:[#allocation3 + $0x3c0] sm:$0xff] }
 0x6e0   :  { %2542 = vmatprep.subr.bf16.mxu0 %v2394_v56  ;;  %v2454_v56 = vld [vmem:[#allocation3 + $0x3d8] sm:$0xff] }
 0x6e3   :  { %2543 = vmatpush1.bf16.msra.mxu0 %v2393_v60  ;;  %v2453_v60 = vld [vmem:[#allocation3 + $0x3d0] sm:$0xff] }
 0x6e4   :  { %2553 = vmatprep.subr.bf16.mxu0 %v2396_v61  ;;  %v2456_v61 = vld [vmem:[#allocation3 + $0x3e8] sm:$0xff] }
 0x6e6   :  { %2545 = vmatmul.mubr.bf16.vlgmr.msra.gmra.mrb[12].mxu0 %v2321_v48  ;;  %v2406_v48 = vld [vmem:[#allocation3 + $0x258] sm:$0xff] }
 0x6e7   :  { %2554 = vmatpush1.bf16.msra.mxu0 %v2395_v3  ;;  %2585 = vmatprep.mubr.bf16.mxu0 %v2324_v44  ;;  %v2407_v44 = vld [vmem:[#allocation3 + $0x260] sm:$0xff] }
 0x6e8   :  { %2555 = vmatprep.subr.bf16.mxu0 %v2398_v32  ;;  %v2455_v3 = vld [vmem:[#allocation3 + $0x3e0] sm:$0xff]  ;;  %v2458_v32 = vld [vmem:[#allocation3 + $0x3f8] sm:$0xff] }
 0x6eb   :  { %2556 = vmatpush1.bf16.msra.mxu0 %v2397_v0  ;;  %v2457_v0 = vld [vmem:[#allocation3 + $0x3f0] sm:$0xff] }
 0x6ec   :  { %2557 = vmatprep.subr.bf16.mxu0 %v2400_v9  ;;  %v2459_v9 = vld [vmem:[#allocation15] sm:$0x3] }
 0x6ef   :  { %2558 = vmatpush1.bf16.msra.mxu0 %v2399_v13  ;;  %v2464_v13 = vrot.slane %v2459_v9, %v3422_v8 }
 0x6f0   :  { %2559 = vmatprep.subr.bf16.mxu0 %v2402_v50  ;;  %v2468_v50 = vrot.slane %v2459_v9, %v3425_v10 }
 0x6f3   :  { %2560 = vmatpush1.bf16.msra.mxu0 %v2401_v11 }
 0x6f4   :  { %2561 = vmatprep.subr.bf16.mxu0 %v2404_v52 }
 0x6f7   :  { %2562 = vmatpush1.bf16.msra.mxu0 %v2403_v6 }
 0x6f8   :  { %2563 = vmatprep.subr.bf16.mxu0 %v2406_v48 }
 0x6fb   :  { %2564 = vmatpush1.bf16.msra.mxu0 %v2405_v17 }
 0x6fc   :  { %2565 = vmatprep.subr.bf16.mxu0 %v2408_v41 }
 0x6ff   :  { %2566 = vmatpush1.bf16.msra.mxu0 %v2407_v44 }
 0x700   :  { %2567 = vmatprep.subr.bf16.mxu0 %v2410_v12 }
 0x703   :  { %2568 = vmatpush1.bf16.msra.mxu0 %v2409_v15 }
 0x704   :  { %2569 = vmatprep.subr.bf16.mxu0 %v2412_v19 }
 0x707   :  { %2570 = vmatpush1.bf16.msra.mxu0 %v2411_v2 }
 0x708   :  { %2571 = vmatprep.subr.bf16.mxu0 %v2414_v18 }
 0x70b   :  { %2572 = vmatpush1.bf16.msra.mxu0 %v2413_v63 }
 0x70c   :  { %2573 = vmatprep.subr.bf16.mxu0 %v2416_v59 }
 0x70f   :  { %2574 = vmatpush1.bf16.msra.mxu0 %v2415_v30 }
 0x710   :  { %2575 = vmatprep.subr.bf16.mxu0 %v2418_v20 }
 0x713   :  { %2576 = vmatpush1.bf16.msra.mxu0 %v2417_v21 }
 0x714   :  { %2577 = vmatprep.subr.bf16.mxu0 %v2420_v7 }
 0x717   :  { %2578 = vmatpush1.bf16.msra.mxu0 %v2419_v14 }
 0x718   :  { %2579 = vmatprep.subr.bf16.mxu0 %v2422_v25 }
 0x71b   :  { %2580 = vmatpush1.bf16.msra.mxu0 %v2421_v42 }
 0x71c   :  { %2581 = vmatprep.subr.bf16.mxu0 %v2424_v26 }
 0x71f   :  { %2582 = vmatpush1.bf16.msra.mxu0 %v2423_v28 }
 0x720   :  { %2583 = vmatprep.subr.bf16.mxu0 %v2426_v45 }
 0x723   :  { %2584 = vmatpush1.bf16.msra.mxu0 %v2425_v46 }
 0x724   :  { %2594 = vmatprep.subr.bf16.mxu0 %v2428_v5 }
 0x726   :  { %2586 = vmatmul.mubr.bf16.vlgmr.msra.gmra.mrb[12].mxu0 %v2323_v51  ;;  %v2438_v51 = vld [vmem:[#allocation3 + $0x358] sm:$0xff] }
 0x727   :  { %2595 = vmatpush1.bf16.msra.mxu0 %v2427_v62  ;;  %2626 = vmatprep.mubr.bf16.mxu0 %v2326_v54  ;;  %v2439_v54 = vld [vmem:[#allocation3 + $0x360] sm:$0xff] }
 0x728   :  { %2596 = vmatprep.subr.bf16.mxu0 %v2430_v24 }
 0x72b   :  { %2597 = vmatpush1.bf16.msra.mxu0 %v2429_v57 }
 0x72c   :  { %2598 = vmatprep.subr.bf16.mxu0 %v2432_v31 }
 0x72f   :  { %2599 = vmatpush1.bf16.msra.mxu0 %v2431_v34 }
 0x730   :  { %2600 = vmatprep.subr.bf16.mxu0 %v2434_v37 }
 0x733   :  { %2601 = vmatpush1.bf16.msra.mxu0 %v2433_v39 }
 0x734   :  { %2602 = vmatprep.subr.bf16.mxu0 %v2436_v40 }
 0x737   :  { %2603 = vmatpush1.bf16.msra.mxu0 %v2435_v23 }
 0x738   :  { %2604 = vmatprep.subr.bf16.mxu0 %v2438_v51 }
 0x73b   :  { %2605 = vmatpush1.bf16.msra.mxu0 %v2437_v43 }
 0x73c   :  { %2606 = vmatprep.subr.bf16.mxu0 %v2440_v16 }
 0x73f   :  { %2607 = vmatpush1.bf16.msra.mxu0 %v2439_v54 }
 0x740   :  { %2608 = vmatprep.subr.bf16.mxu0 %v2442_v47 }
 0x743   :  { %2609 = vmatpush1.bf16.msra.mxu0 %v2441_v49 }
 0x744   :  { %2610 = vmatprep.subr.bf16.mxu0 %v2444_v55 }
 0x747   :  { %2611 = vmatpush1.bf16.msra.mxu0 %v2443_v58 }
 0x748   :  { %2612 = vmatprep.subr.bf16.mxu0 %v2446_v1 }
 0x74b   :  { %2613 = vmatpush1.bf16.msra.mxu0 %v2445_v4 }
 0x74c   :  { %2614 = vmatprep.subr.bf16.mxu0 %v2448_v36 }
 0x74f   :  { %2615 = vmatpush1.bf16.msra.mxu0 %v2447_v38 }
 0x750   :  { %2616 = vmatprep.subr.bf16.mxu0 %v2450_v27 }
 0x753   :  { %2617 = vmatpush1.bf16.msra.mxu0 %v2449_v33 }
 0x754   :  { %2618 = vmatprep.subr.bf16.mxu0 %v2452_v29 }
 0x757   :  { %2619 = vmatpush1.bf16.msra.mxu0 %v2451_v35 }
 0x758   :  { %2620 = vmatprep.subr.bf16.mxu0 %v2454_v56 }
 0x75b   :  { %2621 = vmatpush1.bf16.msra.mxu0 %v2453_v60 }
 0x75c   :  { %2622 = vmatprep.subr.bf16.mxu0 %v2456_v61 }
 0x75f   :  { %2623 = vmatpush1.bf16.msra.mxu0 %v2455_v3 }
 0x760   :  { %2624 = vmatprep.subr.bf16.mxu0 %v2458_v32 }
 0x763   :  { %2625 = vmatpush1.bf16.msra.mxu0 %v2457_v0 }
 0x766   :  { %2627 = vmatmul.mubr.bf16.vlgmr.msra.gmra.mrb[12].mxu0 %v2325_v53 }
 0x839   :  { %v2628_v11 = vpop.f32.mrb[12].mxu0 }
 0x83a   :  { %v2803_v52 = vadd.f32 %v2628_v11, %v2464_v13  ;;  %v2630_v6 = vpop.f32.mrb[13].mxu0 }
 0x83b   :  { %v2804_v48 = vadd.f32 %v2630_v6, %v2468_v50  ;;  %v2632_v17 = vpop.f32.mrb[14].mxu0 }
 0x83c   :  { %3011 = vtanh.f32 %v2803_v52  ;;  %v2633_v41 = vpop.f32.mrb[15].mxu0 }
 0x83d   :  { %3013 = vtanh.f32 %v2804_v48 }
 0x846   :  { %v3012_v44 = vpop.eup %3011 }
 0x847   :  { %v3014_v12 = vpop.eup %3013 }
 0x848   :  { %v2763_v15 = vpack.c.bf16 %v3014_v12, %v3012_v44 }
 0x84a   :  { %2645 = vst [vmem:[%s3769_s17] sm:$0xff] %v2763_v15 }
 0x84b   :  { %2650 = vsyncpa [#allocation6], 1 }
 0x84c   :  { %2651 = vsyncpa [#allocation8], 1 }
 0x84d   :  { %2652 = vsyncpa [#allocation11], 1 }
 0x84e   :  { %2653 = vsyncpa [#allocation14], 1 }
 0x84f   :  { %2654 = vsyncmov [#allocation4] }
 0x852   :  { %s2655_s27 = vpop.sfrf %2654 }
 0x853   :  { %p2761_p0 = scmp.ne.s32.totalorder %s2655_s27, 0 }
 0x855   :  { %2659 = shalt.err (%p2761_p0)  }
 0x856   :  { %2661 = vsyncmov [#allocation4 + $0x1] }
 0x859   :  { %s2662_s19 = vpop.sfrf %2661 }
 0x85a   :  { %p2762_p1 = scmp.ne.s32.totalorder %s2662_s19, 0 }
 0x85c   :  { %2666 = shalt.err (%p2762_p1)  }

</bundles_post_ra>
